<compile_context>
chip_gen: v7x
topology: tpu7x:2x2x1
jax: 0.10.0
libtpu: 0.0.40
codegen_flags: <defaults>
</compile_context>

<pallas_src>
import jax
import jax.numpy as jnp
from jax.experimental import pallas as pl
from jax.experimental.pallas import tpu as pltpu

INPUT_DIM = 224
HIDDEN = (224, 128, 64, 32)       # hidden_dim of the module
LEAKY_SLOPE = 0.2
BIDIRECTIONAL = True              # required 'bidirection' kwarg
N_LAYERS = 1                      # required 'n_layers' kwarg (config chosen here)
LIVE_GATES = (0, 2, 3)            # PyTorch gate order i, f, g, o; f is dead (c0 == 0)


def _lstm_predictor_kernel(
    x_ref,            # (TB, I)      bf16 batch tile
    wg_ref,           # (6, I, H)    bf16  [fwd i,g,o, rev i,g,o]  (W_ih^T per gate)
    bg_ref,           # (6, 1, H)    f32   b_ih + b_hh per live gate, both dirs
    w_out_ref,        # (2, H, H1)   bf16  output Linear split into fwd/rev halves
    w1_ref,           # (H1, H2)     bf16
    w2_ref,           # (H2, H3)     bf16
    smalls_ref,       # (8, 128)     f32: row0 b_out, row1 b1, row2 b2, row3 b3, row4 w3
    o_ref,            # (TB, 1)      f32
):
    H1, H2, H3 = HIDDEN[1], HIDDEN[2], HIDDEN[3]
    x = x_ref[...]   # bf16

    def lstm_dir(d):
        # seq_len == 1 with h0 == c0 == 0:
        #   - h0 @ W_hh is identically zero (only b_hh survives, folded into bg),
        #   - the forget gate multiplies c0 == 0 and drops out entirely.
        base = 3 * d
        gi = jnp.dot(x, wg_ref[base + 0], preferred_element_type=jnp.float32) + bg_ref[base + 0]
        gg = jnp.dot(x, wg_ref[base + 1], preferred_element_type=jnp.float32) + bg_ref[base + 1]
        go = jnp.dot(x, wg_ref[base + 2], preferred_element_type=jnp.float32) + bg_ref[base + 2]
        c = jax.nn.sigmoid(gi) * jnp.tanh(gg)
        return jax.nn.sigmoid(go) * jnp.tanh(c)

    h_f = lstm_dir(0)
    h_r = lstm_dir(1)

    # LeakyReLU(0.2); Dropout is inference mode -> identity.
    # TODO(synk): training-mode dropout (p=0.5) not modeled; forward is eval-mode.
    a_f = jnp.where(h_f > 0, h_f, LEAKY_SLOPE * h_f).astype(jnp.bfloat16)
    a_r = jnp.where(h_r > 0, h_r, LEAKY_SLOPE * h_r).astype(jnp.bfloat16)

    b_out = smalls_ref[0:1, :H1]
    b1 = smalls_ref[1:2, :H2]
    b2 = smalls_ref[2:3, :H3]
    b3 = smalls_ref[3:4, 0:1]
    w3_row = smalls_ref[4:5, :H3]

    # self.output on concat([h_fwd, h_rev]) == split-weight matmuls summed
    # (avoids a lane-dim concat inside the kernel).
    z = (jnp.dot(a_f, w_out_ref[0], preferred_element_type=jnp.float32)
         + jnp.dot(a_r, w_out_ref[1], preferred_element_type=jnp.float32)
         + b_out)

    # layer_final: Linear -> Tanh -> Linear -> Tanh -> Linear(-> 1)
    z = jnp.tanh(jnp.dot(z.astype(jnp.bfloat16), w1_ref[...],
                         preferred_element_type=jnp.float32) + b1)
    z = jnp.tanh(jnp.dot(z.astype(jnp.bfloat16), w2_ref[...],
                         preferred_element_type=jnp.float32) + b2)
    # Final (H3 -> 1) projection on VPU + lane reduce (avoids an N=1 MXU matmul).
    y = jnp.sum(z * w3_row, axis=-1, keepdims=True) + b3
    o_ref[...] = y.astype(o_ref.dtype)


def init_params(key):
    """Deterministic PyTorch-style (uniform(-1/sqrt(fan), 1/sqrt(fan))) params."""
    I, H = INPUT_DIM, HIDDEN[0]
    H1, H2, H3 = HIDDEN[1], HIDDEN[2], HIDDEN[3]

    def u(k, shape, fan):
        lim = 1.0 / jnp.sqrt(jnp.float32(fan))
        return jax.random.uniform(k, shape, jnp.float32, -lim, lim)

    ks = jax.random.split(key, 16)
    p = {
        # nn.LSTM layer 0, forward + reverse (PyTorch layout: W_ih (4H, I), gates i,f,g,o)
        "w_ih_f": u(ks[0], (4 * H, I), H),
        "b_ih_f": u(ks[1], (4 * H,), H),
        "b_hh_f": u(ks[2], (4 * H,), H),
        "w_ih_r": u(ks[3], (4 * H, I), H),
        "b_ih_r": u(ks[4], (4 * H,), H),
        "b_hh_r": u(ks[5], (4 * H,), H),
        # W_hh never contributes for seq_len==1 (h0 == 0), so it is omitted.
        # self.output: Linear(2H -> H1)
        "w_out": u(ks[6], (H1, 2 * H), 2 * H),
        "b_out": u(ks[7], (H1,), 2 * H),
        # layer_final
        "w1": u(ks[8], (H2, H1), H1),
        "b1": u(ks[9], (H2,), H1),
        "w2": u(ks[10], (H3, H2), H2),
        "b2": u(ks[11], (H3,), H2),
        "w3": u(ks[12], (1, H3), H3),
        "b3": u(ks[13], (1,), H3),
    }
    return p


def pack_params(p):
    """Transform PyTorch-layout f32 params into the kernel layout (bf16 weights)."""
    I, H = INPUT_DIM, HIDDEN[0]
    H1, H2, H3 = HIDDEN[1], HIDDEN[2], HIDDEN[3]
    live = jnp.array(LIVE_GATES)

    def pack_dir(w_ih, b_ih, b_hh):
        wg = w_ih.reshape(4, H, I)[live]                     # (3, H, I) - drop f gate
        wg = wg.transpose(0, 2, 1).astype(jnp.bfloat16)      # (3, I, H)
        bg = (b_ih + b_hh).reshape(4, 1, H)[live]            # (3, 1, H)  f32
        return wg, bg

    wg_f, bg_f = pack_dir(p["w_ih_f"], p["b_ih_f"], p["b_hh_f"])
    wg_r, bg_r = pack_dir(p["w_ih_r"], p["b_ih_r"], p["b_hh_r"])
    wg = jnp.concatenate([wg_f, wg_r], axis=0)               # (6, I, H) bf16
    bg = jnp.concatenate([bg_f, bg_r], axis=0)                # (6, 1, H) f32

    w_out = p["w_out"].T.astype(jnp.bfloat16).reshape(2, H, H1)   # fwd half, rev half

    w1 = p["w1"].T.astype(jnp.bfloat16)                      # (H1, H2)
    w2 = p["w2"].T.astype(jnp.bfloat16)                      # (H2, H3)

    # Consolidated lane-dense buffer for all tiny tensors (one DMA instead of five).
    smalls = jnp.zeros((8, 128), jnp.float32)
    smalls = smalls.at[0, :H1].set(p["b_out"])
    smalls = smalls.at[1, :H2].set(p["b1"])
    smalls = smalls.at[2, :H3].set(p["b2"])
    smalls = smalls.at[3, 0].set(p["b3"][0])
    smalls = smalls.at[4, :H3].set(p["w3"][0])

    return (wg, bg, w_out, w1, w2, smalls)


def _round_up(n, m):
    return ((n + m - 1) // m) * m


@jax.jit
def lstm_predictor_forward(x, *packed):
    B, I = x.shape
    H, H1, H2, H3 = HIDDEN

    # Batch tile: up to 512 rows to amortize per-step grid overhead, always a
    # multiple of 8 (sublane alignment).  Resident weights (~0.75 MB bf16) plus
    # double-buffered (TB, I) bf16 x tiles fit well under 32 MiB scoped VMEM
    # (v7x-safe).
    TB = min(512, _round_up(B, 8))
    Bp = _round_up(B, TB)

    xb = x.astype(jnp.bfloat16)
    if Bp != B:
        xb = jnp.pad(xb, ((0, Bp - B), (0, 0)))

    def resident(*block_shape):
        nd = len(block_shape)
        return pl.BlockSpec(block_shape, lambda i, _nd=nd: (0,) * _nd)

    out = pl.pallas_call(
        _lstm_predictor_kernel,
        out_shape=jax.ShapeDtypeStruct((Bp, 1), jnp.float32),
        grid=(Bp // TB,),
        in_specs=[
            pl.BlockSpec((TB, I), lambda i: (i, 0)),   # x: tiled over batch
            resident(6, I, H),                         # wg  (both dirs, live gates)
            resident(6, 1, H),                         # bg
            resident(2, H, H1),                        # w_out (fwd/rev halves)
            resident(H1, H2),                          # w1
            resident(H2, H3),                          # w2
            resident(8, 128),                          # smalls (biases + w3 row)
        ],
        out_specs=pl.BlockSpec((TB, 1), lambda i: (i, 0)),
        compiler_params=pltpu.CompilerParams(
            dimension_semantics=("parallel",),         # v7x: shard batch over both TCs
            vmem_limit_bytes=32 * 1024 * 1024,
        ),
    )(xb, *packed)
    return out[:B]


def reference_forward(x, p):
    """Plain-JAX f32 reference of the exact same forward math (eval-mode dropout)."""
    def lstm_step(w_ih, b_ih, b_hh):
        gates = x @ w_ih.T + b_ih + b_hh
        i, f, g, o = jnp.split(gates, 4, axis=-1)
        c = jax.nn.sigmoid(i) * jnp.tanh(g)               # f * c0 == 0
        return jax.nn.sigmoid(o) * jnp.tanh(c)

    h = jnp.concatenate(
        [lstm_step(p["w_ih_f"], p["b_ih_f"], p["b_hh_f"]),
         lstm_step(p["w_ih_r"], p["b_ih_r"], p["b_hh_r"])], axis=-1)
    a = jnp.where(h > 0, h, LEAKY_SLOPE * h)
    z = a @ p["w_out"].T + p["b_out"]
    z = jnp.tanh(z @ p["w1"].T + p["b1"])
    z = jnp.tanh(z @ p["w2"].T + p["b2"])
    return z @ p["w3"].T + p["b3"]


if __name__ == "__main__":
    key = jax.random.PRNGKey(0)
    pkey, xkey = jax.random.split(key)
    params = init_params(pkey)
    packed = pack_params(params)

    B = 8
    x = jax.random.normal(xkey, (B, INPUT_DIM), jnp.float32)

    out = lstm_predictor_forward(x, *packed)
    jax.block_until_ready(out)

    ref = reference_forward(x, params)
    assert out.shape == (B, 1), out.shape
    # bf16 weights/activations in the kernel vs f32 reference -> loosened tolerance.
    assert jnp.allclose(out, ref, rtol=2e-2, atol=2e-2), (out, ref)
    print("KERNEL_OK")
</pallas_src>

<mosaic_0001>
module attributes {stable_mosaic.version = 11 : i64} {
  func.func @_lstm_predictor_kernel(%arg0: i32, %arg1: memref<8x224xbf16, #tpu.memory_space<vmem>>, %arg2: memref<6x224x224xbf16, #tpu.memory_space<vmem>>, %arg3: memref<6x1x224xf32, #tpu.memory_space<vmem>>, %arg4: memref<2x224x128xbf16, #tpu.memory_space<vmem>>, %arg5: memref<128x64xbf16, #tpu.memory_space<vmem>>, %arg6: memref<64x32xbf16, #tpu.memory_space<vmem>>, %arg7: memref<8x128xf32, #tpu.memory_space<vmem>>, %arg8: memref<8x1xf32, #tpu.memory_space<vmem>>) attributes {dimension_semantics = [#tpu.dimension_semantics<parallel>], iteration_bounds = array<i64: 1>, scalar_prefetch = 0 : i64, scratch_operands = 0 : i64, tpu.core_type = #tpu.core_type<tc>, window_params = [{transform_indices = @transform_0, window_bounds = array<i64: 8, 224>}, {pipeline_mode = #tpu.pipeline_mode<synchronous>, transform_indices = @transform_1, window_bounds = array<i64: 6, 224, 224>}, {pipeline_mode = #tpu.pipeline_mode<synchronous>, transform_indices = @transform_2, window_bounds = array<i64: 6, 1, 224>}, {pipeline_mode = #tpu.pipeline_mode<synchronous>, transform_indices = @transform_3, window_bounds = array<i64: 2, 224, 128>}, {pipeline_mode = #tpu.pipeline_mode<synchronous>, transform_indices = @transform_4, window_bounds = array<i64: 128, 64>}, {pipeline_mode = #tpu.pipeline_mode<synchronous>, transform_indices = @transform_5, window_bounds = array<i64: 64, 32>}, {pipeline_mode = #tpu.pipeline_mode<synchronous>, transform_indices = @transform_6, window_bounds = array<i64: 8, 128>}, {transform_indices = @transform_7, window_bounds = array<i64: 8, 1>}]} {
    %c0 = arith.constant 0 : index
    %c0_0 = arith.constant 0 : index
    %0 = vector.load %arg1[%c0, %c0_0] : memref<8x224xbf16, #tpu.memory_space<vmem>>, vector<8x224xbf16>
    %c0_1 = arith.constant 0 : index
    %c0_2 = arith.constant 0 : index
    %c0_3 = arith.constant 0 : index
    %1 = vector.load %arg2[%c0_1, %c0_2, %c0_3] : memref<6x224x224xbf16, #tpu.memory_space<vmem>>, vector<1x224x224xbf16>
    %2 = vector.shape_cast %1 : vector<1x224x224xbf16> to vector<224x224xbf16>
    %cst = arith.constant dense<0.000000e+00> : vector<8x224xf32>
    %3 = tpu.matmul %0, %2, %cst {dimension_numbers = #tpu.dot_dimension_numbers<[1], [0], [0], [1], [0, 0, 1, 1], [], []>} : vector<8x224xbf16>, vector<224x224xbf16>, vector<8x224xf32> -> vector<8x224xf32>
    %c0_4 = arith.constant 0 : index
    %c0_5 = arith.constant 0 : index
    %c0_6 = arith.constant 0 : index
    %4 = vector.load %arg3[%c0_4, %c0_5, %c0_6] : memref<6x1x224xf32, #tpu.memory_space<vmem>>, vector<1x1x224xf32>
    %5 = vector.shape_cast %4 : vector<1x1x224xf32> to vector<1x224xf32>
    %6 = vector.broadcast %5 : vector<1x224xf32> to vector<8x224xf32>
    %7 = arith.addf %3, %6 : vector<8x224xf32>
    %c1 = arith.constant 1 : index
    %c0_7 = arith.constant 0 : index
    %c0_8 = arith.constant 0 : index
    %8 = vector.load %arg2[%c1, %c0_7, %c0_8] : memref<6x224x224xbf16, #tpu.memory_space<vmem>>, vector<1x224x224xbf16>
    %9 = vector.shape_cast %8 : vector<1x224x224xbf16> to vector<224x224xbf16>
    %cst_9 = arith.constant dense<0.000000e+00> : vector<8x224xf32>
    %10 = tpu.matmul %0, %9, %cst_9 {dimension_numbers = #tpu.dot_dimension_numbers<[1], [0], [0], [1], [0, 0, 1, 1], [], []>} : vector<8x224xbf16>, vector<224x224xbf16>, vector<8x224xf32> -> vector<8x224xf32>
    %c1_10 = arith.constant 1 : index
    %c0_11 = arith.constant 0 : index
    %c0_12 = arith.constant 0 : index
    %11 = vector.load %arg3[%c1_10, %c0_11, %c0_12] : memref<6x1x224xf32, #tpu.memory_space<vmem>>, vector<1x1x224xf32>
    %12 = vector.shape_cast %11 : vector<1x1x224xf32> to vector<1x224xf32>
    %13 = vector.broadcast %12 : vector<1x224xf32> to vector<8x224xf32>
    %14 = arith.addf %10, %13 : vector<8x224xf32>
    %c2 = arith.constant 2 : index
    %c0_13 = arith.constant 0 : index
    %c0_14 = arith.constant 0 : index
    %15 = vector.load %arg2[%c2, %c0_13, %c0_14] : memref<6x224x224xbf16, #tpu.memory_space<vmem>>, vector<1x224x224xbf16>
    %16 = vector.shape_cast %15 : vector<1x224x224xbf16> to vector<224x224xbf16>
    %cst_15 = arith.constant dense<0.000000e+00> : vector<8x224xf32>
    %17 = tpu.matmul %0, %16, %cst_15 {dimension_numbers = #tpu.dot_dimension_numbers<[1], [0], [0], [1], [0, 0, 1, 1], [], []>} : vector<8x224xbf16>, vector<224x224xbf16>, vector<8x224xf32> -> vector<8x224xf32>
    %c2_16 = arith.constant 2 : index
    %c0_17 = arith.constant 0 : index
    %c0_18 = arith.constant 0 : index
    %18 = vector.load %arg3[%c2_16, %c0_17, %c0_18] : memref<6x1x224xf32, #tpu.memory_space<vmem>>, vector<1x1x224xf32>
    %19 = vector.shape_cast %18 : vector<1x1x224xf32> to vector<1x224xf32>
    %20 = vector.broadcast %19 : vector<1x224xf32> to vector<8x224xf32>
    %21 = arith.addf %17, %20 : vector<8x224xf32>
    %22 = arith.negf %7 : vector<8x224xf32>
    %23 = math.exp %22 : vector<8x224xf32>
    %cst_19 = arith.constant 1.000000e+00 : f32
    %24 = vector.broadcast %cst_19 : f32 to vector<8x224xf32>
    %25 = arith.addf %24, %23 : vector<8x224xf32>
    %26 = arith.divf %24, %25 : vector<8x224xf32>
    %27 = math.tanh %14 : vector<8x224xf32>
    %28 = arith.mulf %26, %27 : vector<8x224xf32>
    %29 = arith.negf %21 : vector<8x224xf32>
    %30 = math.exp %29 : vector<8x224xf32>
    %cst_20 = arith.constant 1.000000e+00 : f32
    %31 = vector.broadcast %cst_20 : f32 to vector<8x224xf32>
    %32 = arith.addf %31, %30 : vector<8x224xf32>
    %33 = arith.divf %31, %32 : vector<8x224xf32>
    %34 = math.tanh %28 : vector<8x224xf32>
    %35 = arith.mulf %33, %34 : vector<8x224xf32>
    %c3 = arith.constant 3 : index
    %c0_21 = arith.constant 0 : index
    %c0_22 = arith.constant 0 : index
    %36 = vector.load %arg2[%c3, %c0_21, %c0_22] : memref<6x224x224xbf16, #tpu.memory_space<vmem>>, vector<1x224x224xbf16>
    %37 = vector.shape_cast %36 : vector<1x224x224xbf16> to vector<224x224xbf16>
    %cst_23 = arith.constant dense<0.000000e+00> : vector<8x224xf32>
    %38 = tpu.matmul %0, %37, %cst_23 {dimension_numbers = #tpu.dot_dimension_numbers<[1], [0], [0], [1], [0, 0, 1, 1], [], []>} : vector<8x224xbf16>, vector<224x224xbf16>, vector<8x224xf32> -> vector<8x224xf32>
    %c3_24 = arith.constant 3 : index
    %c0_25 = arith.constant 0 : index
    %c0_26 = arith.constant 0 : index
    %39 = vector.load %arg3[%c3_24, %c0_25, %c0_26] : memref<6x1x224xf32, #tpu.memory_space<vmem>>, vector<1x1x224xf32>
    %40 = vector.shape_cast %39 : vector<1x1x224xf32> to vector<1x224xf32>
    %41 = vector.broadcast %40 : vector<1x224xf32> to vector<8x224xf32>
    %42 = arith.addf %38, %41 : vector<8x224xf32>
    %c4 = arith.constant 4 : index
    %c0_27 = arith.constant 0 : index
    %c0_28 = arith.constant 0 : index
    %43 = vector.load %arg2[%c4, %c0_27, %c0_28] : memref<6x224x224xbf16, #tpu.memory_space<vmem>>, vector<1x224x224xbf16>
    %44 = vector.shape_cast %43 : vector<1x224x224xbf16> to vector<224x224xbf16>
    %cst_29 = arith.constant dense<0.000000e+00> : vector<8x224xf32>
    %45 = tpu.matmul %0, %44, %cst_29 {dimension_numbers = #tpu.dot_dimension_numbers<[1], [0], [0], [1], [0, 0, 1, 1], [], []>} : vector<8x224xbf16>, vector<224x224xbf16>, vector<8x224xf32> -> vector<8x224xf32>
    %c4_30 = arith.constant 4 : index
    %c0_31 = arith.constant 0 : index
    %c0_32 = arith.constant 0 : index
    %46 = vector.load %arg3[%c4_30, %c0_31, %c0_32] : memref<6x1x224xf32, #tpu.memory_space<vmem>>, vector<1x1x224xf32>
    %47 = vector.shape_cast %46 : vector<1x1x224xf32> to vector<1x224xf32>
    %48 = vector.broadcast %47 : vector<1x224xf32> to vector<8x224xf32>
    %49 = arith.addf %45, %48 : vector<8x224xf32>
    %c5 = arith.constant 5 : index
    %c0_33 = arith.constant 0 : index
    %c0_34 = arith.constant 0 : index
    %50 = vector.load %arg2[%c5, %c0_33, %c0_34] : memref<6x224x224xbf16, #tpu.memory_space<vmem>>, vector<1x224x224xbf16>
    %51 = vector.shape_cast %50 : vector<1x224x224xbf16> to vector<224x224xbf16>
    %cst_35 = arith.constant dense<0.000000e+00> : vector<8x224xf32>
    %52 = tpu.matmul %0, %51, %cst_35 {dimension_numbers = #tpu.dot_dimension_numbers<[1], [0], [0], [1], [0, 0, 1, 1], [], []>} : vector<8x224xbf16>, vector<224x224xbf16>, vector<8x224xf32> -> vector<8x224xf32>
    %c5_36 = arith.constant 5 : index
    %c0_37 = arith.constant 0 : index
    %c0_38 = arith.constant 0 : index
    %53 = vector.load %arg3[%c5_36, %c0_37, %c0_38] : memref<6x1x224xf32, #tpu.memory_space<vmem>>, vector<1x1x224xf32>
    %54 = vector.shape_cast %53 : vector<1x1x224xf32> to vector<1x224xf32>
    %55 = vector.broadcast %54 : vector<1x224xf32> to vector<8x224xf32>
    %56 = arith.addf %52, %55 : vector<8x224xf32>
    %57 = arith.negf %42 : vector<8x224xf32>
    %58 = math.exp %57 : vector<8x224xf32>
    %cst_39 = arith.constant 1.000000e+00 : f32
    %59 = vector.broadcast %cst_39 : f32 to vector<8x224xf32>
    %60 = arith.addf %59, %58 : vector<8x224xf32>
    %61 = arith.divf %59, %60 : vector<8x224xf32>
    %62 = math.tanh %49 : vector<8x224xf32>
    %63 = arith.mulf %61, %62 : vector<8x224xf32>
    %64 = arith.negf %56 : vector<8x224xf32>
    %65 = math.exp %64 : vector<8x224xf32>
    %cst_40 = arith.constant 1.000000e+00 : f32
    %66 = vector.broadcast %cst_40 : f32 to vector<8x224xf32>
    %67 = arith.addf %66, %65 : vector<8x224xf32>
    %68 = arith.divf %66, %67 : vector<8x224xf32>
    %69 = math.tanh %63 : vector<8x224xf32>
    %70 = arith.mulf %68, %69 : vector<8x224xf32>
    %cst_41 = arith.constant 0.000000e+00 : f32
    %71 = vector.broadcast %cst_41 : f32 to vector<8x224xf32>
    %72 = arith.cmpf ogt, %35, %71 : vector<8x224xf32>
    %cst_42 = arith.constant 2.000000e-01 : f32
    %73 = vector.broadcast %cst_42 : f32 to vector<8x224xf32>
    %74 = arith.mulf %73, %35 : vector<8x224xf32>
    %75 = arith.select %72, %35, %74 : vector<8x224xi1>, vector<8x224xf32>
    %76 = arith.truncf %75 : vector<8x224xf32> to vector<8x224xbf16>
    %cst_43 = arith.constant 0.000000e+00 : f32
    %77 = vector.broadcast %cst_43 : f32 to vector<8x224xf32>
    %78 = arith.cmpf ogt, %70, %77 : vector<8x224xf32>
    %cst_44 = arith.constant 2.000000e-01 : f32
    %79 = vector.broadcast %cst_44 : f32 to vector<8x224xf32>
    %80 = arith.mulf %79, %70 : vector<8x224xf32>
    %81 = arith.select %78, %70, %80 : vector<8x224xi1>, vector<8x224xf32>
    %82 = arith.truncf %81 : vector<8x224xf32> to vector<8x224xbf16>
    %c0_45 = arith.constant 0 : index
    %c0_46 = arith.constant 0 : index
    %83 = vector.load %arg7[%c0_45, %c0_46] : memref<8x128xf32, #tpu.memory_space<vmem>>, vector<1x128xf32>
    %c1_47 = arith.constant 1 : index
    %c0_48 = arith.constant 0 : index
    %84 = vector.load %arg7[%c1_47, %c0_48] : memref<8x128xf32, #tpu.memory_space<vmem>>, vector<1x64xf32>
    %c2_49 = arith.constant 2 : index
    %c0_50 = arith.constant 0 : index
    %85 = vector.load %arg7[%c2_49, %c0_50] : memref<8x128xf32, #tpu.memory_space<vmem>>, vector<1x32xf32>
    %c3_51 = arith.constant 3 : index
    %c0_52 = arith.constant 0 : index
    %86 = vector.load %arg7[%c3_51, %c0_52] : memref<8x128xf32, #tpu.memory_space<vmem>>, vector<1x1xf32>
    %c4_53 = arith.constant 4 : index
    %c0_54 = arith.constant 0 : index
    %87 = vector.load %arg7[%c4_53, %c0_54] : memref<8x128xf32, #tpu.memory_space<vmem>>, vector<1x32xf32>
    %c0_55 = arith.constant 0 : index
    %c0_56 = arith.constant 0 : index
    %c0_57 = arith.constant 0 : index
    %88 = vector.load %arg4[%c0_55, %c0_56, %c0_57] : memref<2x224x128xbf16, #tpu.memory_space<vmem>>, vector<1x224x128xbf16>
    %89 = vector.shape_cast %88 : vector<1x224x128xbf16> to vector<224x128xbf16>
    %cst_58 = arith.constant dense<0.000000e+00> : vector<8x128xf32>
    %90 = tpu.matmul %76, %89, %cst_58 {dimension_numbers = #tpu.dot_dimension_numbers<[1], [0], [0], [1], [0, 0, 1, 1], [], []>} : vector<8x224xbf16>, vector<224x128xbf16>, vector<8x128xf32> -> vector<8x128xf32>
    %c1_59 = arith.constant 1 : index
    %c0_60 = arith.constant 0 : index
    %c0_61 = arith.constant 0 : index
    %91 = vector.load %arg4[%c1_59, %c0_60, %c0_61] : memref<2x224x128xbf16, #tpu.memory_space<vmem>>, vector<1x224x128xbf16>
    %92 = vector.shape_cast %91 : vector<1x224x128xbf16> to vector<224x128xbf16>
    %cst_62 = arith.constant dense<0.000000e+00> : vector<8x128xf32>
    %93 = tpu.matmul %82, %92, %cst_62 {dimension_numbers = #tpu.dot_dimension_numbers<[1], [0], [0], [1], [0, 0, 1, 1], [], []>} : vector<8x224xbf16>, vector<224x128xbf16>, vector<8x128xf32> -> vector<8x128xf32>
    %94 = arith.addf %90, %93 : vector<8x128xf32>
    %95 = vector.broadcast %83 : vector<1x128xf32> to vector<8x128xf32>
    %96 = arith.addf %94, %95 : vector<8x128xf32>
    %97 = arith.truncf %96 : vector<8x128xf32> to vector<8x128xbf16>
    %c0_63 = arith.constant 0 : index
    %c0_64 = arith.constant 0 : index
    %98 = vector.load %arg5[%c0_63, %c0_64] : memref<128x64xbf16, #tpu.memory_space<vmem>>, vector<128x64xbf16>
    %cst_65 = arith.constant dense<0.000000e+00> : vector<8x64xf32>
    %99 = tpu.matmul %97, %98, %cst_65 {dimension_numbers = #tpu.dot_dimension_numbers<[1], [0], [0], [1], [0, 0, 1, 1], [], []>} : vector<8x128xbf16>, vector<128x64xbf16>, vector<8x64xf32> -> vector<8x64xf32>
    %100 = vector.broadcast %84 : vector<1x64xf32> to vector<8x64xf32>
    %101 = arith.addf %99, %100 : vector<8x64xf32>
    %102 = math.tanh %101 : vector<8x64xf32>
    %103 = arith.truncf %102 : vector<8x64xf32> to vector<8x64xbf16>
    %c0_66 = arith.constant 0 : index
    %c0_67 = arith.constant 0 : index
    %104 = vector.load %arg6[%c0_66, %c0_67] : memref<64x32xbf16, #tpu.memory_space<vmem>>, vector<64x32xbf16>
    %cst_68 = arith.constant dense<0.000000e+00> : vector<8x32xf32>
    %105 = tpu.matmul %103, %104, %cst_68 {dimension_numbers = #tpu.dot_dimension_numbers<[1], [0], [0], [1], [0, 0, 1, 1], [], []>} : vector<8x64xbf16>, vector<64x32xbf16>, vector<8x32xf32> -> vector<8x32xf32>
    %106 = vector.broadcast %85 : vector<1x32xf32> to vector<8x32xf32>
    %107 = arith.addf %105, %106 : vector<8x32xf32>
    %108 = math.tanh %107 : vector<8x32xf32>
    %109 = vector.broadcast %87 : vector<1x32xf32> to vector<8x32xf32>
    %110 = arith.mulf %108, %109 : vector<8x32xf32>
    %cst_69 = arith.constant dense<0.000000e+00> : vector<8xf32>
    %111 = vector.multi_reduction <add>, %110, %cst_69 [1] : vector<8x32xf32> to vector<8xf32>
    %112 = vector.shape_cast %111 : vector<8xf32> to vector<8x1xf32>
    %113 = vector.broadcast %86 : vector<1x1xf32> to vector<8x1xf32>
    %114 = arith.addf %112, %113 : vector<8x1xf32>
    %c0_70 = arith.constant 0 : index
    %c0_71 = arith.constant 0 : index
    %115 = vector.load %arg8[%c0_70, %c0_71] : memref<8x1xf32, #tpu.memory_space<vmem>>, vector<8x1xf32>
    tpu.vector_store %arg8[%c0_70, %c0_71], %114 {strides = array<i32>} : memref<8x1xf32, #tpu.memory_space<vmem>>, vector<8x1xf32>,
    return
  }
  func.func @transform_0(%arg0: i32) -> (i32, i32) {
    %c0_i32 = arith.constant 0 : i32
    %c0_i32_0 = arith.constant 0 : i32
    return %arg0, %c0_i32 : i32, i32
  }
  func.func @transform_1(%arg0: i32) -> (i32, i32, i32) {
    %c0_i32 = arith.constant 0 : i32
    %c0_i32_0 = arith.constant 0 : i32
    %c0_i32_1 = arith.constant 0 : i32
    %c0_i32_2 = arith.constant 0 : i32
    return %c0_i32, %c0_i32_0, %c0_i32_1 : i32, i32, i32
  }
  func.func @transform_2(%arg0: i32) -> (i32, i32, i32) {
    %c0_i32 = arith.constant 0 : i32
    %c0_i32_0 = arith.constant 0 : i32
    %c0_i32_1 = arith.constant 0 : i32
    %c0_i32_2 = arith.constant 0 : i32
    return %c0_i32, %c0_i32_0, %c0_i32_1 : i32, i32, i32
  }
  func.func @transform_3(%arg0: i32) -> (i32, i32, i32) {
    %c0_i32 = arith.constant 0 : i32
    %c0_i32_0 = arith.constant 0 : i32
    %c0_i32_1 = arith.constant 0 : i32
    %c0_i32_2 = arith.constant 0 : i32
    return %c0_i32, %c0_i32_0, %c0_i32_1 : i32, i32, i32
  }
  func.func @transform_4(%arg0: i32) -> (i32, i32) {
    %c0_i32 = arith.constant 0 : i32
    %c0_i32_0 = arith.constant 0 : i32
    %c0_i32_1 = arith.constant 0 : i32
    return %c0_i32, %c0_i32_0 : i32, i32
  }
  func.func @transform_5(%arg0: i32) -> (i32, i32) {
    %c0_i32 = arith.constant 0 : i32
    %c0_i32_0 = arith.constant 0 : i32
    %c0_i32_1 = arith.constant 0 : i32
    return %c0_i32, %c0_i32_0 : i32, i32
  }
  func.func @transform_6(%arg0: i32) -> (i32, i32) {
    %c0_i32 = arith.constant 0 : i32
    %c0_i32_0 = arith.constant 0 : i32
    %c0_i32_1 = arith.constant 0 : i32
    return %c0_i32, %c0_i32_0 : i32, i32
  }
  func.func @transform_7(%arg0: i32) -> (i32, i32) {
    %c0_i32 = arith.constant 0 : i32
    %c0_i32_0 = arith.constant 0 : i32
    return %arg0, %c0_i32 : i32, i32
  }
}

</mosaic_0001>

<bundles_post_ra>
// kernel: lstm_predictor_forward.1
= control target key start
LH: loop header
LB: loop body
LE: loop exit
PB: predicated region body
PF: predicated region fallthrough
CT: control target
= control target key end

     0   :  { %12 = vsyncpa [#allocation3], 0  ;;  %s2919_s0 = inlined_call_operand.vmem [shape: bf16[8,224], index: 0, kind: input, shape index: {}]   ;;  %s2920_s1 = inlined_call_operand.hbm [shape: bf16[6,224,224], index: 1, kind: input, shape index: {}]   ;;  %s2921_s2 = inlined_call_operand.vmem [shape: f32[6,1,224], index: 2, kind: input, shape index: {}]   ;;  %s2922_s3 = inlined_call_operand.hbm [shape: bf16[2,224,128], index: 3, kind: input, shape index: {}]   ;;  %s2923_s4 = inlined_call_operand.vmem [shape: bf16[128,64], index: 4, kind: input, shape index: {}]   ;;  %s2924_s5 = inlined_call_operand.vmem [shape: bf16[64,32], index: 5, kind: input, shape index: {}]   ;;  %s2925_s6 = inlined_call_operand.vmem [shape: f32[8,128], index: 6, kind: input, shape index: {}]   ;;  %s2926_s7 = inlined_call_operand.vmem [shape: f32[8,1], index: 7, kind: output, shape index: {}]  }
   0x1   :  { %13 = vsyncpa [#allocation5], 0  ;;  %s2703_s24 = smov [#allocation2]   ;;  %s2655_s28 = scalar_lea.hbm %s2920_s1, 21504 }
   0x2   :  { %s21_s25 = sshll.u32 %s2703_s24, 4  ;;  %p2656_p0 = scmp.ne.s32.totalorder %s2920_s1, %s2655_s28  ;;  %s22_s25 = int_to_ptr.vmem [resolvable:$true] %s21_s25 }
   0x3   :  { %p2659_p1 = scmp.lt.u32.totalorder %s2655_s28, %s2920_s1 }
   0x5   :  { %p2661_p2 = pnand %p2659_p1, %p2656_p0 }
   0x7   :  { %2664 = shalt.err (!%p2661_p2)
}
   0x8   :  { %s2665_s10 = scalar_lea.vmem %s22_s25, 21504  ;;  %p2670_p4 = scmp.lt.s32.totalorder %s22_s25, %s22_s25 }
   0x9   :  { %p2666_p3 = scmp.ne.s32.totalorder %s22_s25, %s2665_s10  ;;  %p2671_p5 = scmp.lt.s32.totalorder %s2665_s10, %s2665_s10 }
   0xb   :  { %p2672_p6 = por %p2671_p5, %p2670_p4 }
   0xd   :  { %p2673_p7 = pnand %p2672_p6, %p2666_p3 }
   0xf   :  { %2676 = shalt.err (!%p2673_p7)
}
  0x10   :  { %s2704_s11 = smov 128   ;;  %s2705_s12 = smov 8  }
  0x11   :  { %27 = dma.hbm_to_vmem [thread:$0]  %s2920_s1, 21504, %s22_s25, [#allocation3], %s2704_s11, %s2704_s11, %s2705_s12  }
  0x12   :  { %s2706_s15 = smov [#allocation4]   ;;  %s2677_s19 = scalar_lea.hbm %s2922_s3, 3584 }
  0x13   :  { %s35_s16 = sshll.u32 %s2706_s15, 4  ;;  %p2678_p8 = scmp.ne.s32.totalorder %s2922_s3, %s2677_s19  ;;  %s36_s16 = int_to_ptr.vmem [resolvable:$true] %s35_s16 }
  0x14   :  { %p2681_p9 = scmp.lt.u32.totalorder %s2677_s19, %s2922_s3 }
  0x16   :  { %p2683_p10 = pnand %p2681_p9, %p2678_p8 }
  0x18   :  { %2686 = shalt.err (!%p2683_p10)
}
  0x19   :  { %s2687_s24 = scalar_lea.vmem %s36_s16, 3584  ;;  %p2692_p12 = scmp.lt.s32.totalorder %s36_s16, %s36_s16 }
  0x1a   :  { %p2688_p11 = scmp.ne.s32.totalorder %s36_s16, %s2687_s24  ;;  %p2693_p13 = scmp.lt.s32.totalorder %s2687_s24, %s2687_s24 }
  0x1c   :  { %p2694_p0 = por %p2693_p13, %p2692_p12 }
  0x1e   :  { %p2695_p1 = pnand %p2694_p0, %p2688_p11 }
  0x20   :  { %2698 = shalt.err (!%p2695_p1)
}
  0x21   :  { %s2707_s1 = smov 64   ;;  %s2708_s25 = smov 4  }
  0x22   :  { %41 = dma.hbm_to_vmem [thread:$0]  %s2922_s3, 3584, %s36_s16, [#allocation5], %s2707_s1, %s2707_s1, %s2708_s25  }
  0x23   :  { %2699 = dma.done.wait [#allocation3], 21504  }
  0x24   :  { %2700 = vsyncadd [#allocation3], 4294945792 }
  0x25   :  { %2701 = dma.done.wait [#allocation5], 3584  }
  0x26   :  { %2702 = vsyncadd [#allocation5], 4294963712  ;;  %v2309_v0 = vld [vmem:[#allocation2 + $0x4] ss:$8 sps:$4 sm:$0xff]   ;;  %v2313_v2 = vld [vmem:[#allocation2] ss:$8 sps:$4 sm:$0xff]  }
  0x27   :  { %v2311_v1 = vld [vmem:[#allocation2 + $0xe4] ss:$8 sps:$4 sm:$0xff]   ;;  %246 = vmatprep.subr.bf16.mxu0 %v2309_v0  ;;  %v2314_v3 = vld [vmem:[#allocation2 + $0xe0] ss:$8 sps:$4 sm:$0xff]   ;;  %v2315_v4 = vld [vmem:[#allocation2 + $0x14] ss:$8 sps:$4 sm:$0xff]  }
  0x28   :  { %469 = vmatprep.subr.bf16.mxu1 %v2311_v1  ;;  %247 = vmatpush1.bf16.msra.mxu0 %v2313_v2  ;;  %v2317_v5 = vld [vmem:[#allocation2 + $0xf4] ss:$8 sps:$4 sm:$0xff]   ;;  %v2319_v6 = vld [vmem:[#allocation2 + $0x10] ss:$8 sps:$4 sm:$0xff]   ;;  %v2321_v8 = vld [vmem:[#allocation2 + $0x24] ss:$8 sps:$4 sm:$0xff]  }
  0x29   :  { %470 = vmatpush1.bf16.msra.mxu1 %v2314_v3  ;;  %248 = vmatprep.subr.bf16.mxu0 %v2315_v4  ;;  %v2320_v7 = vld [vmem:[#allocation2 + $0xf0] ss:$8 sps:$4 sm:$0xff]   ;;  %v2323_v9 = vld [vmem:[#allocation2 + $0x104] ss:$8 sps:$4 sm:$0xff]   ;;  %v2325_v10 = vld [vmem:[#allocation2 + $0x20] ss:$8 sps:$4 sm:$0xff]  }
  0x2a   :  { %471 = vmatprep.subr.bf16.mxu1 %v2317_v5  ;;  %v2326_v11 = vld [vmem:[#allocation2 + $0x100] ss:$8 sps:$4 sm:$0xff]   ;;  %v2327_v12 = vld [vmem:[#allocation2 + $0x34] ss:$8 sps:$4 sm:$0xff]   ;;  %v2331_v14 = vld [vmem:[#allocation2 + $0x30] ss:$8 sps:$4 sm:$0xff]  }
  0x2b   :  { %v2329_v13 = vld [vmem:[#allocation2 + $0x114] ss:$8 sps:$4 sm:$0xff]   ;;  %v2332_v15 = vld [vmem:[#allocation2 + $0x110] ss:$8 sps:$4 sm:$0xff]   ;;  %v2333_v16 = vld [vmem:[#allocation2 + $0x44] ss:$8 sps:$4 sm:$0xff]  }
  0x2c   :  { %249 = vmatpush1.bf16.msra.mxu0 %v2319_v6  ;;  %v2335_v17 = vld [vmem:[#allocation2 + $0x124] ss:$8 sps:$4 sm:$0xff]   ;;  %v2337_v18 = vld [vmem:[#allocation2 + $0x40] ss:$8 sps:$4 sm:$0xff]   ;;  %v2339_v20 = vld [vmem:[#allocation2 + $0x54] ss:$8 sps:$4 sm:$0xff]  }
  0x2d   :  { %472 = vmatpush1.bf16.msra.mxu1 %v2320_v7  ;;  %250 = vmatprep.subr.bf16.mxu0 %v2321_v8  ;;  %v2338_v19 = vld [vmem:[#allocation2 + $0x120] ss:$8 sps:$4 sm:$0xff]   ;;  %v2341_v21 = vld [vmem:[#allocation2 + $0x134] ss:$8 sps:$4 sm:$0xff]   ;;  %v2343_v22 = vld [vmem:[#allocation2 + $0x50] ss:$8 sps:$4 sm:$0xff]  }
  0x2e   :  { %473 = vmatprep.subr.bf16.mxu1 %v2323_v9  ;;  %v2344_v23 = vld [vmem:[#allocation2 + $0x130] ss:$8 sps:$4 sm:$0xff]   ;;  %v2345_v24 = vld [vmem:[#allocation2 + $0x64] ss:$8 sps:$4 sm:$0xff]   ;;  %v2349_v26 = vld [vmem:[#allocation2 + $0x60] ss:$8 sps:$4 sm:$0xff]  }
  0x2f   :  { %v2347_v25 = vld [vmem:[#allocation2 + $0x144] ss:$8 sps:$4 sm:$0xff]   ;;  %v2350_v27 = vld [vmem:[#allocation2 + $0x140] ss:$8 sps:$4 sm:$0xff]   ;;  %v2351_v28 = vld [vmem:[#allocation2 + $0x74] ss:$8 sps:$4 sm:$0xff]  }
  0x30   :  { %251 = vmatpush1.bf16.msra.mxu0 %v2325_v10  ;;  %v2353_v29 = vld [vmem:[#allocation2 + $0x154] ss:$8 sps:$4 sm:$0xff]   ;;  %v2355_v30 = vld [vmem:[#allocation2 + $0x70] ss:$8 sps:$4 sm:$0xff]   ;;  %v2357_v32 = vld [vmem:[#allocation2 + $0x84] ss:$8 sps:$4 sm:$0xff]  }
  0x31   :  { %474 = vmatpush1.bf16.msra.mxu1 %v2326_v11  ;;  %252 = vmatprep.subr.bf16.mxu0 %v2327_v12  ;;  %v2356_v31 = vld [vmem:[#allocation2 + $0x150] ss:$8 sps:$4 sm:$0xff]   ;;  %v2359_v33 = vld [vmem:[#allocation2 + $0x164] ss:$8 sps:$4 sm:$0xff]   ;;  %v2361_v34 = vld [vmem:[#allocation2 + $0x80] ss:$8 sps:$4 sm:$0xff]  }
  0x32   :  { %475 = vmatprep.subr.bf16.mxu1 %v2329_v13  ;;  %v2362_v35 = vld [vmem:[#allocation2 + $0x160] ss:$8 sps:$4 sm:$0xff]   ;;  %v2363_v36 = vld [vmem:[#allocation2 + $0x94] ss:$8 sps:$4 sm:$0xff]   ;;  %v2367_v38 = vld [vmem:[#allocation2 + $0x90] ss:$8 sps:$4 sm:$0xff]  }
  0x33   :  { %v2365_v37 = vld [vmem:[#allocation2 + $0x174] ss:$8 sps:$4 sm:$0xff]   ;;  %v2368_v39 = vld [vmem:[#allocation2 + $0x170] ss:$8 sps:$4 sm:$0xff]   ;;  %v2369_v40 = vld [vmem:[#allocation2 + $0xa4] ss:$8 sps:$4 sm:$0xff]  }
  0x34   :  { %253 = vmatpush1.bf16.msra.mxu0 %v2331_v14  ;;  %v2371_v41 = vld [vmem:[#allocation2 + $0x184] ss:$8 sps:$4 sm:$0xff]   ;;  %v2373_v44 = vld [vmem:[#allocation2 + $0xa0] ss:$8 sps:$4 sm:$0xff]   ;;  %vm242_vm0 = vcmask 785408   ;;  %vm2711_vm5 = vmmov 0  }
  0x35   :  { %476 = vmatpush1.bf16.msra.mxu1 %v2332_v15  ;;  %254 = vmatprep.subr.bf16.mxu0 %v2333_v16  ;;  %v55_v42 = vld [vmem:[%s2919_s0] sm:$0xff]  ;;  %v2375_v46 = vld [vmem:[#allocation2 + $0xb4] ss:$8 sps:$4 sm:$0xff]   ;;  %v2379_v48 = vld [vmem:[#allocation2 + $0xb0] ss:$8 sps:$4 sm:$0xff]   ;;  %vm1950_vm6 = vcmask 523264  }
  0x36   :  { %477 = vmatprep.subr.bf16.mxu1 %v2335_v17  ;;  %v2779_v43 = vcombine.high %v55_v42, %v55_v42  ;;  %v2374_v45 = vld [vmem:[#allocation2 + $0x180] ss:$8 sps:$4 sm:$0xff]   ;;  %v2377_v47 = vld [vmem:[#allocation2 + $0x194] ss:$8 sps:$4 sm:$0xff]   ;;  %v2380_v49 = vld [vmem:[#allocation2 + $0x190] ss:$8 sps:$4 sm:$0xff]   ;;  %v2785_v60 = vcombine.low %v55_v42, %v55_v42 }
  0x37   :  { %v2381_v50 = vld [vmem:[#allocation2 + $0xc4] ss:$8 sps:$4 sm:$0xff]   ;;  %v2385_v52 = vld [vmem:[#allocation2 + $0xc0] ss:$8 sps:$4 sm:$0xff]   ;;  %v2387_v54 = vld [vmem:[#allocation2 + $0xd4] ss:$8 sps:$4 sm:$0xff]  }
  0x38   :  { %255 = vmatpush1.bf16.msra.mxu0 %v2337_v18  ;;  %2047 = vmatprep.mubr.msk.bf16.mxu0 %vm242_vm0, %v2779_v43  ;;  %v2383_v51 = vld [vmem:[#allocation2 + $0x1a4] ss:$8 sps:$4 sm:$0xff]   ;;  %v2386_v53 = vld [vmem:[#allocation2 + $0x1a0] ss:$8 sps:$4 sm:$0xff]   ;;  %v2389_v55 = vld [vmem:[#allocation2 + $0x1b4] ss:$8 sps:$4 sm:$0xff]  }
  0x39   :  { %478 = vmatpush1.bf16.msra.mxu1 %v2338_v19  ;;  %256 = vmatprep.subr.bf16.mxu0 %v2339_v20  ;;  %v2391_v56 = vld [vmem:[#allocation2 + $0xd0] ss:$8 sps:$4 sm:$0xff]   ;;  %v2397_v58 = vld [vmem:[#allocation2 + $0x1c4] ss:$8 sps:$4 sm:$0xff]   ;;  %v2395_v61 = vld [vmem:[#allocation2 + $0x1c0] ss:$8 sps:$4 sm:$0xff]  }
  0x3a   :  { %479 = vmatprep.subr.bf16.mxu1 %v2341_v21  ;;  %2077 = vmatprep.mubr.msk.bf16.mxu1 %vm242_vm0, %v2779_v43  ;;  %v2392_v57 = vld [vmem:[#allocation2 + $0x1b0] ss:$8 sps:$4 sm:$0xff]   ;;  %v2400_v59 = vld [vmem:[#allocation2 + $0x2a4] ss:$8 sps:$4 sm:$0xff]   ;;  %v2398_v62 = vld [vmem:[#allocation2 + $0x2a0] ss:$8 sps:$4 sm:$0xff]  }
  0x3b   :  { %v2403_v63 = vld [vmem:[#allocation2 + $0x1d4] ss:$8 sps:$4 sm:$0xff]   ;;  %v2401_v1 = vld [vmem:[#allocation2 + $0x1d0] ss:$8 sps:$4 sm:$0xff]   ;;  %v2409_v3 = vld [vmem:[#allocation2 + $0x1e4] ss:$8 sps:$4 sm:$0xff]  }
  0x3c   :  { %257 = vmatpush1.bf16.msra.mxu0 %v2343_v22  ;;  %v2406_v0 = vld [vmem:[#allocation2 + $0x2b4] ss:$8 sps:$4 sm:$0xff]   ;;  %v2404_v2 = vld [vmem:[#allocation2 + $0x2b0] ss:$8 sps:$4 sm:$0xff]   ;;  %v2412_v4 = vld [vmem:[#allocation2 + $0x2c4] ss:$8 sps:$4 sm:$0xff]  }
  0x3d   :  { %480 = vmatpush1.bf16.msra.mxu1 %v2344_v23  ;;  %258 = vmatprep.subr.bf16.mxu0 %v2345_v24  ;;  %v2407_v5 = vld [vmem:[#allocation2 + $0x1e0] ss:$8 sps:$4 sm:$0xff]   ;;  %v2415_v7 = vld [vmem:[#allocation2 + $0x1f4] ss:$8 sps:$4 sm:$0xff]   ;;  %v2413_v9 = vld [vmem:[#allocation2 + $0x1f0] ss:$8 sps:$4 sm:$0xff]  }
  0x3e   :  { %481 = vmatprep.subr.bf16.mxu1 %v2347_v25  ;;  %v2410_v6 = vld [vmem:[#allocation2 + $0x2c0] ss:$8 sps:$4 sm:$0xff]   ;;  %v2418_v8 = vld [vmem:[#allocation2 + $0x2d4] ss:$8 sps:$4 sm:$0xff]   ;;  %v2416_v10 = vld [vmem:[#allocation2 + $0x2d0] ss:$8 sps:$4 sm:$0xff]  }
  0x3f   :  { %v2421_v11 = vld [vmem:[#allocation2 + $0x204] ss:$8 sps:$4 sm:$0xff]   ;;  %v2419_v13 = vld [vmem:[#allocation2 + $0x200] ss:$8 sps:$4 sm:$0xff]   ;;  %v2427_v15 = vld [vmem:[#allocation2 + $0x214] ss:$8 sps:$4 sm:$0xff]  }
  0x40   :  { %259 = vmatpush1.bf16.msra.mxu0 %v2349_v26  ;;  %v2424_v12 = vld [vmem:[#allocation2 + $0x2e4] ss:$8 sps:$4 sm:$0xff]   ;;  %v2422_v14 = vld [vmem:[#allocation2 + $0x2e0] ss:$8 sps:$4 sm:$0xff]   ;;  %v2430_v16 = vld [vmem:[#allocation2 + $0x2f4] ss:$8 sps:$4 sm:$0xff]  }
  0x41   :  { %482 = vmatpush1.bf16.msra.mxu1 %v2350_v27  ;;  %260 = vmatprep.subr.bf16.mxu0 %v2351_v28  ;;  %v2425_v17 = vld [vmem:[#allocation2 + $0x210] ss:$8 sps:$4 sm:$0xff]   ;;  %v2433_v19 = vld [vmem:[#allocation2 + $0x224] ss:$8 sps:$4 sm:$0xff]   ;;  %v2431_v21 = vld [vmem:[#allocation2 + $0x220] ss:$8 sps:$4 sm:$0xff]  }
  0x42   :  { %483 = vmatprep.subr.bf16.mxu1 %v2353_v29  ;;  %v2428_v18 = vld [vmem:[#allocation2 + $0x2f0] ss:$8 sps:$4 sm:$0xff]   ;;  %v2436_v20 = vld [vmem:[#allocation2 + $0x304] ss:$8 sps:$4 sm:$0xff]   ;;  %v2434_v22 = vld [vmem:[#allocation2 + $0x300] ss:$8 sps:$4 sm:$0xff]  }
  0x43   :  { %v2439_v23 = vld [vmem:[#allocation2 + $0x234] ss:$8 sps:$4 sm:$0xff]   ;;  %v2437_v25 = vld [vmem:[#allocation2 + $0x230] ss:$8 sps:$4 sm:$0xff]   ;;  %v2445_v27 = vld [vmem:[#allocation2 + $0x244] ss:$8 sps:$4 sm:$0xff]  }
  0x44   :  { %261 = vmatpush1.bf16.msra.mxu0 %v2355_v30  ;;  %v2442_v24 = vld [vmem:[#allocation2 + $0x314] ss:$8 sps:$4 sm:$0xff]   ;;  %v2440_v26 = vld [vmem:[#allocation2 + $0x310] ss:$8 sps:$4 sm:$0xff]   ;;  %v2448_v28 = vld [vmem:[#allocation2 + $0x324] ss:$8 sps:$4 sm:$0xff]  }
  0x45   :  { %484 = vmatpush1.bf16.msra.mxu1 %v2356_v31  ;;  %262 = vmatprep.subr.bf16.mxu0 %v2357_v32  ;;  %v2443_v29 = vld [vmem:[#allocation2 + $0x240] ss:$8 sps:$4 sm:$0xff]   ;;  %v2451_v31 = vld [vmem:[#allocation2 + $0x254] ss:$8 sps:$4 sm:$0xff]   ;;  %v2464_v42 = vld [vmem:[#allocation2 + $0x350] ss:$8 sps:$4 sm:$0xff]  }
  0x46   :  { %485 = vmatprep.subr.bf16.mxu1 %v2359_v33  ;;  %v2446_v30 = vld [vmem:[#allocation2 + $0x320] ss:$8 sps:$4 sm:$0xff]   ;;  %v2454_v32 = vld [vmem:[#allocation2 + $0x334] ss:$8 sps:$4 sm:$0xff]   ;;  %v2449_v33 = vld [vmem:[#allocation2 + $0x250] ss:$8 sps:$4 sm:$0xff]  }
  0x47   :  { %vm2000_vm7 = vcmask 261120   ;;  %vm2009_vm8 = vcmask 7168  }
  0x48   :  { %263 = vmatpush1.bf16.msra.mxu0 %v2361_v34  ;;  %v2452_v34 = vld [vmem:[#allocation2 + $0x330] ss:$8 sps:$4 sm:$0xff]  }
  0x49   :  { %486 = vmatpush1.bf16.msra.mxu1 %v2362_v35  ;;  %264 = vmatprep.subr.bf16.mxu0 %v2363_v36  ;;  %v2457_v35 = vld [vmem:[#allocation2 + $0x264] ss:$8 sps:$4 sm:$0xff]  }
  0x4a   :  { %487 = vmatprep.subr.bf16.mxu1 %v2365_v37  ;;  %v2460_v36 = vld [vmem:[#allocation2 + $0x344] ss:$8 sps:$4 sm:$0xff]   ;;  %v2455_v37 = vld [vmem:[#allocation2 + $0x260] ss:$8 sps:$4 sm:$0xff]  }
  0x4c   :  { %265 = vmatpush1.bf16.msra.mxu0 %v2367_v38  ;;  %v2458_v38 = vld [vmem:[#allocation2 + $0x340] ss:$8 sps:$4 sm:$0xff]  }
  0x4d   :  { %488 = vmatpush1.bf16.msra.mxu1 %v2368_v39  ;;  %266 = vmatprep.subr.bf16.mxu0 %v2369_v40  ;;  %v2463_v39 = vld [vmem:[#allocation2 + $0x274] ss:$8 sps:$4 sm:$0xff]  }
  0x4e   :  { %489 = vmatprep.subr.bf16.mxu1 %v2371_v41  ;;  %v2466_v40 = vld [vmem:[#allocation2 + $0x354] ss:$8 sps:$4 sm:$0xff]   ;;  %v2461_v41 = vld [vmem:[#allocation2 + $0x270] ss:$8 sps:$4 sm:$0xff]  }
  0x50   :  { %267 = vmatpush1.bf16.msra.mxu0 %v2373_v44  ;;  %v2469_v44 = vld [vmem:[#allocation2 + $0x284] ss:$8 sps:$4 sm:$0xff]  }
  0x51   :  { %490 = vmatpush1.bf16.msra.mxu1 %v2374_v45  ;;  %268 = vmatprep.subr.bf16.mxu0 %v2375_v46  ;;  %v2472_v45 = vld [vmem:[#allocation2 + $0x364] ss:$8 sps:$4 sm:$0xff]   ;;  %v2467_v46 = vld [vmem:[#allocation2 + $0x280] ss:$8 sps:$4 sm:$0xff]  }
  0x52   :  { %491 = vmatprep.subr.bf16.mxu1 %v2377_v47  ;;  %v2470_v47 = vld [vmem:[#allocation2 + $0x360] ss:$8 sps:$4 sm:$0xff]  }
  0x54   :  { %269 = vmatpush1.bf16.msra.mxu0 %v2379_v48  ;;  %v2475_v48 = vld [vmem:[#allocation2 + $0x294] ss:$8 sps:$4 sm:$0xff]  }
  0x55   :  { %492 = vmatpush1.bf16.msra.mxu1 %v2380_v49  ;;  %270 = vmatprep.subr.bf16.mxu0 %v2381_v50  ;;  %v2478_v49 = vld [vmem:[#allocation2 + $0x374] ss:$8 sps:$4 sm:$0xff]   ;;  %v2473_v50 = vld [vmem:[#allocation2 + $0x290] ss:$8 sps:$4 sm:$0xff]  }
  0x56   :  { %493 = vmatprep.subr.bf16.mxu1 %v2383_v51  ;;  %v2476_v51 = vld [vmem:[#allocation2 + $0x370] ss:$8 sps:$4 sm:$0xff]  }
  0x58   :  { %271 = vmatpush1.bf16.msra.mxu0 %v2385_v52  ;;  %v2481_v52 = vld [vmem:[#allocation2 + $0x384] ss:$8 sps:$4 sm:$0xff]  }
  0x59   :  { %494 = vmatpush1.bf16.msra.mxu1 %v2386_v53  ;;  %272 = vmatprep.subr.bf16.mxu0 %v2387_v54  ;;  %v2484_v53 = vld [vmem:[#allocation2 + $0x464] ss:$8 sps:$4 sm:$0xff]   ;;  %v2479_v54 = vld [vmem:[#allocation2 + $0x380] ss:$8 sps:$4 sm:$0xff]  }
  0x5a   :  { %495 = vmatprep.subr.bf16.mxu1 %v2389_v55  ;;  %v2482_v55 = vld [vmem:[#allocation2 + $0x460] ss:$8 sps:$4 sm:$0xff]  }
  0x5c   :  { %273 = vmatpush1.bf16.msra.mxu0 %v2391_v56  ;;  %v2487_v56 = vld [vmem:[#allocation2 + $0x394] ss:$8 sps:$4 sm:$0xff]  }
  0x5d   :  { %496 = vmatpush1.bf16.msra.mxu1 %v2392_v57  ;;  %692 = vmatprep.subr.bf16.mxu0 %v2397_v58  ;;  %v2490_v57 = vld [vmem:[#allocation2 + $0x474] ss:$8 sps:$4 sm:$0xff]   ;;  %v2485_v58 = vld [vmem:[#allocation2 + $0x390] ss:$8 sps:$4 sm:$0xff]  }
  0x5e   :  { %947 = vmatprep.subr.bf16.mxu1 %v2400_v59  ;;  %v2488_v59 = vld [vmem:[#allocation2 + $0x470] ss:$8 sps:$4 sm:$0xff]  }
  0x5f   :  { %279 = vmatmul.mubr.bf16.vlgmr.msra.gmra.mrb[0].mxu0 %v2785_v60 }
  0x60   :  { %502 = vmatmul.mubr.bf16.vlgmr.msra.gmra.mrb[0].mxu1 %v2785_v60  ;;  %693 = vmatpush1.bf16.msra.mxu0 %v2395_v61  ;;  %v2493_v61 = vld [vmem:[#allocation2 + $0x3a4] ss:$8 sps:$4 sm:$0xff]  }
  0x61   :  { %948 = vmatpush1.bf16.msra.mxu1 %v2398_v62  ;;  %694 = vmatprep.subr.bf16.mxu0 %v2403_v63  ;;  %v2496_v62 = vld [vmem:[#allocation2 + $0x484] ss:$8 sps:$4 sm:$0xff]   ;;  %v2491_v63 = vld [vmem:[#allocation2 + $0x3a0] ss:$8 sps:$4 sm:$0xff]  }
  0x62   :  { %949 = vmatprep.subr.bf16.mxu1 %v2406_v0  ;;  %2107 = vmatprep.mubr.msk.bf16.mxu0 %vm242_vm0, %v2779_v43  ;;  %v2494_v0 = vld [vmem:[#allocation2 + $0x480] ss:$8 sps:$4 sm:$0xff]  }
  0x63   :  { %2141 = vmatprep.mubr.msk.bf16.mxu1 %vm242_vm0, %v2779_v43 }
  0x64   :  { %695 = vmatpush1.bf16.msra.mxu0 %v2401_v1  ;;  %v2499_v1 = vld [vmem:[#allocation2 + $0x3b4] ss:$8 sps:$4 sm:$0xff]  }
  0x65   :  { %950 = vmatpush1.bf16.msra.mxu1 %v2404_v2  ;;  %696 = vmatprep.subr.bf16.mxu0 %v2409_v3  ;;  %v2502_v2 = vld [vmem:[#allocation2 + $0x494] ss:$8 sps:$4 sm:$0xff]   ;;  %v2497_v3 = vld [vmem:[#allocation2 + $0x3b0] ss:$8 sps:$4 sm:$0xff]  }
  0x66   :  { %951 = vmatprep.subr.bf16.mxu1 %v2412_v4  ;;  %v2500_v4 = vld [vmem:[#allocation2 + $0x490] ss:$8 sps:$4 sm:$0xff]  }
  0x68   :  { %697 = vmatpush1.bf16.msra.mxu0 %v2407_v5  ;;  %v2505_v5 = vld [vmem:[#allocation2 + $0x3c4] ss:$8 sps:$4 sm:$0xff]  }
  0x69   :  { %952 = vmatpush1.bf16.msra.mxu1 %v2410_v6  ;;  %698 = vmatprep.subr.bf16.mxu0 %v2415_v7  ;;  %v2508_v6 = vld [vmem:[#allocation2 + $0x4a4] ss:$8 sps:$4 sm:$0xff]   ;;  %v2503_v7 = vld [vmem:[#allocation2 + $0x3c0] ss:$8 sps:$4 sm:$0xff]  }
  0x6a   :  { %953 = vmatprep.subr.bf16.mxu1 %v2418_v8  ;;  %v2506_v8 = vld [vmem:[#allocation2 + $0x4a0] ss:$8 sps:$4 sm:$0xff]  }
  0x6c   :  { %699 = vmatpush1.bf16.msra.mxu0 %v2413_v9  ;;  %v2511_v9 = vld [vmem:[#allocation2 + $0x3d4] ss:$8 sps:$4 sm:$0xff]  }
  0x6d   :  { %954 = vmatpush1.bf16.msra.mxu1 %v2416_v10  ;;  %700 = vmatprep.subr.bf16.mxu0 %v2421_v11  ;;  %v2514_v10 = vld [vmem:[#allocation2 + $0x4b4] ss:$8 sps:$4 sm:$0xff]   ;;  %v2512_v11 = vld [vmem:[#allocation2 + $0x4b0] ss:$8 sps:$4 sm:$0xff]  }
  0x6e   :  { %955 = vmatprep.subr.bf16.mxu1 %v2424_v12  ;;  %v2517_v12 = vld [vmem:[#allocation2 + $0x3e4] ss:$8 sps:$4 sm:$0xff]  }
  0x70   :  { %701 = vmatpush1.bf16.msra.mxu0 %v2419_v13  ;;  %v2520_v13 = vld [vmem:[#allocation2 + $0x4c4] ss:$8 sps:$4 sm:$0xff]  }
  0x71   :  { %956 = vmatpush1.bf16.msra.mxu1 %v2422_v14  ;;  %702 = vmatprep.subr.bf16.mxu0 %v2427_v15  ;;  %v2515_v14 = vld [vmem:[#allocation2 + $0x3e0] ss:$8 sps:$4 sm:$0xff]  }
  0x72   :  { %957 = vmatprep.subr.bf16.mxu1 %v2430_v16  ;;  %v2518_v15 = vld [vmem:[#allocation2 + $0x4c0] ss:$8 sps:$4 sm:$0xff]   ;;  %v2523_v16 = vld [vmem:[#allocation2 + $0x3f4] ss:$8 sps:$4 sm:$0xff]  }
  0x74   :  { %703 = vmatpush1.bf16.msra.mxu0 %v2425_v17  ;;  %v2526_v17 = vld [vmem:[#allocation2 + $0x4d4] ss:$8 sps:$4 sm:$0xff]  }
  0x75   :  { %958 = vmatpush1.bf16.msra.mxu1 %v2428_v18  ;;  %704 = vmatprep.subr.bf16.mxu0 %v2433_v19  ;;  %v2521_v18 = vld [vmem:[#allocation2 + $0x3f0] ss:$8 sps:$4 sm:$0xff]  }
  0x76   :  { %959 = vmatprep.subr.bf16.mxu1 %v2436_v20  ;;  %v2524_v19 = vld [vmem:[#allocation2 + $0x4d0] ss:$8 sps:$4 sm:$0xff]   ;;  %v2529_v20 = vld [vmem:[#allocation2 + $0x404] ss:$8 sps:$4 sm:$0xff]  }
  0x78   :  { %705 = vmatpush1.bf16.msra.mxu0 %v2431_v21  ;;  %v2532_v21 = vld [vmem:[#allocation2 + $0x4e4] ss:$8 sps:$4 sm:$0xff]  }
  0x79   :  { %960 = vmatpush1.bf16.msra.mxu1 %v2434_v22  ;;  %706 = vmatprep.subr.bf16.mxu0 %v2439_v23  ;;  %v2527_v22 = vld [vmem:[#allocation2 + $0x400] ss:$8 sps:$4 sm:$0xff]  }
  0x7a   :  { %961 = vmatprep.subr.bf16.mxu1 %v2442_v24  ;;  %v2530_v23 = vld [vmem:[#allocation2 + $0x4e0] ss:$8 sps:$4 sm:$0xff]   ;;  %v2535_v24 = vld [vmem:[#allocation2 + $0x414] ss:$8 sps:$4 sm:$0xff]  }
  0x7c   :  { %707 = vmatpush1.bf16.msra.mxu0 %v2437_v25  ;;  %v2538_v25 = vld [vmem:[#allocation2 + $0x4f4] ss:$8 sps:$4 sm:$0xff]  }
  0x7d   :  { %962 = vmatpush1.bf16.msra.mxu1 %v2440_v26  ;;  %708 = vmatprep.subr.bf16.mxu0 %v2445_v27  ;;  %v2533_v26 = vld [vmem:[#allocation2 + $0x410] ss:$8 sps:$4 sm:$0xff]  }
  0x7e   :  { %963 = vmatprep.subr.bf16.mxu1 %v2448_v28  ;;  %v2536_v27 = vld [vmem:[#allocation2 + $0x4f0] ss:$8 sps:$4 sm:$0xff]   ;;  %v2541_v28 = vld [vmem:[#allocation2 + $0x424] ss:$8 sps:$4 sm:$0xff]  }
  0x80   :  { %709 = vmatpush1.bf16.msra.mxu0 %v2443_v29  ;;  %v2544_v29 = vld [vmem:[#allocation2 + $0x504] ss:$8 sps:$4 sm:$0xff]  }
  0x81   :  { %964 = vmatpush1.bf16.msra.mxu1 %v2446_v30  ;;  %710 = vmatprep.subr.bf16.mxu0 %v2451_v31  ;;  %v2539_v30 = vld [vmem:[#allocation2 + $0x420] ss:$8 sps:$4 sm:$0xff]  }
  0x82   :  { %965 = vmatprep.subr.bf16.mxu1 %v2454_v32  ;;  %v2542_v31 = vld [vmem:[#allocation2 + $0x500] ss:$8 sps:$4 sm:$0xff]   ;;  %v2547_v32 = vld [vmem:[#allocation2 + $0x434] ss:$8 sps:$4 sm:$0xff]  }
  0x84   :  { %711 = vmatpush1.bf16.msra.mxu0 %v2449_v33  ;;  %v2550_v33 = vld [vmem:[#allocation2 + $0x514] ss:$8 sps:$4 sm:$0xff]  }
  0x85   :  { %966 = vmatpush1.bf16.msra.mxu1 %v2452_v34  ;;  %712 = vmatprep.subr.bf16.mxu0 %v2457_v35  ;;  %v2545_v34 = vld [vmem:[#allocation2 + $0x430] ss:$8 sps:$4 sm:$0xff]  }
  0x86   :  { %967 = vmatprep.subr.bf16.mxu1 %v2460_v36  ;;  %v2548_v35 = vld [vmem:[#allocation2 + $0x510] ss:$8 sps:$4 sm:$0xff]   ;;  %v2553_v36 = vld [vmem:[#allocation2 + $0x444] ss:$8 sps:$4 sm:$0xff]  }
  0x88   :  { %713 = vmatpush1.bf16.msra.mxu0 %v2455_v37  ;;  %v2556_v37 = vld [vmem:[#allocation2 + $0x524] ss:$8 sps:$4 sm:$0xff]  }
  0x89   :  { %968 = vmatpush1.bf16.msra.mxu1 %v2458_v38  ;;  %714 = vmatprep.subr.bf16.mxu0 %v2463_v39  ;;  %v2551_v38 = vld [vmem:[#allocation2 + $0x440] ss:$8 sps:$4 sm:$0xff]  }
  0x8a   :  { %969 = vmatprep.subr.bf16.mxu1 %v2466_v40  ;;  %v2554_v39 = vld [vmem:[#allocation2 + $0x520] ss:$8 sps:$4 sm:$0xff]   ;;  %v2559_v40 = vld [vmem:[#allocation2 + $0x454] ss:$8 sps:$4 sm:$0xff]  }
  0x8c   :  { %715 = vmatpush1.bf16.msra.mxu0 %v2461_v41  ;;  %v2562_v41 = vld [vmem:[#allocation2 + $0x534] ss:$8 sps:$4 sm:$0xff]  }
  0x8d   :  { %970 = vmatpush1.bf16.msra.mxu1 %v2464_v42  ;;  %716 = vmatprep.subr.bf16.mxu0 %v2469_v44  ;;  %v2557_v42 = vld [vmem:[#allocation2 + $0x450] ss:$8 sps:$4 sm:$0xff]  }
  0x8e   :  { %971 = vmatprep.subr.bf16.mxu1 %v2472_v45  ;;  %v2560_v44 = vld [vmem:[#allocation2 + $0x530] ss:$8 sps:$4 sm:$0xff]   ;;  %v2563_v45 = vld [vmem:[#allocation4] sm:$0xff]  }
  0x90   :  { %717 = vmatpush1.bf16.msra.mxu0 %v2467_v46  ;;  %v2709_v46 = vmov 0  }
  0x91   :  { %972 = vmatpush1.bf16.msra.mxu1 %v2470_v47  ;;  %718 = vmatprep.subr.bf16.mxu0 %v2475_v48  ;;  %v2564_v47 = vld [vmem:[#allocation4 + $0x8] sm:$0xff]   ;;  %v2565_v48 = vld [vmem:[#allocation4 + $0x10] sm:$0xff]  }
  0x92   :  { %973 = vmatprep.subr.bf16.mxu1 %v2478_v49  ;;  %v2566_v49 = vld [vmem:[#allocation4 + $0x18] sm:$0xff]  }
  0x94   :  { %719 = vmatpush1.bf16.msra.mxu0 %v2473_v50  ;;  %v2568_v50 = vld [vmem:[#allocation4 + $0x28] sm:$0xff]  }
  0x95   :  { %974 = vmatpush1.bf16.msra.mxu1 %v2476_v51  ;;  %1170 = vmatprep.subr.bf16.mxu0 %v2481_v52  ;;  %v2569_v51 = vld [vmem:[#allocation4 + $0x30] sm:$0xff]   ;;  %v2570_v52 = vld [vmem:[#allocation4 + $0x38] sm:$0xff]  }
  0x96   :  { %1393 = vmatprep.subr.bf16.mxu1 %v2484_v53  ;;  %v2571_v53 = vld [vmem:[#allocation4 + $0x40] sm:$0xff]  }
  0x97   :  { %725 = vmatmul.mubr.bf16.vlgmr.msra.gmra.mrb[4].mxu0 %v2785_v60 }
  0x98   :  { %980 = vmatmul.mubr.bf16.vlgmr.msra.gmra.mrb[4].mxu1 %v2785_v60  ;;  %1171 = vmatpush1.bf16.msra.mxu0 %v2479_v54  ;;  %v2572_v54 = vld [vmem:[#allocation4 + $0x48] sm:$0xff]  }
  0x99   :  { %1394 = vmatpush1.bf16.msra.mxu1 %v2482_v55  ;;  %1172 = vmatprep.subr.bf16.mxu0 %v2487_v56  ;;  %v2573_v55 = vld [vmem:[#allocation4 + $0x50] sm:$0xff]   ;;  %v2574_v56 = vld [vmem:[#allocation4 + $0x58] sm:$0xff]  }
  0x9a   :  { %1395 = vmatprep.subr.bf16.mxu1 %v2490_v57  ;;  %2171 = vmatprep.mubr.msk.bf16.mxu0 %vm242_vm0, %v2779_v43  ;;  %v2575_v57 = vld [vmem:[#allocation4 + $0x60] sm:$0xff]  }
  0x9b   :  { %2201 = vmatprep.mubr.msk.bf16.mxu1 %vm242_vm0, %v2779_v43  ;;  %v2509_v43 = vld [vmem:[#allocation2 + $0x3d0] ss:$8 sps:$4 sm:$0xff]  }
  0x9c   :  { %1173 = vmatpush1.bf16.msra.mxu0 %v2485_v58  ;;  %v2576_v58 = vld [vmem:[#allocation4 + $0x68] sm:$0xff]  }
  0x9d   :  { %1396 = vmatpush1.bf16.msra.mxu1 %v2488_v59  ;;  %1174 = vmatprep.subr.bf16.mxu0 %v2493_v61  ;;  %v2577_v59 = vld [vmem:[#allocation4 + $0x70] sm:$0xff]   ;;  %v2578_v61 = vld [vmem:[#allocation4 + $0x78] sm:$0xff]  }
  0x9e   :  { %1397 = vmatprep.subr.bf16.mxu1 %v2496_v62  ;;  %v2579_v62 = vld [vmem:[#allocation4 + $0x80] sm:$0xff]  }
  0xa0   :  { %1175 = vmatpush1.bf16.msra.mxu0 %v2491_v63  ;;  %v2580_v63 = vld [vmem:[#allocation4 + $0x88] sm:$0xff]  }
  0xa1   :  { %1398 = vmatpush1.bf16.msra.mxu1 %v2494_v0  ;;  %1176 = vmatprep.subr.bf16.mxu0 %v2499_v1  ;;  %v2581_v0 = vld [vmem:[#allocation4 + $0x90] sm:$0xff]   ;;  %v86_v1 = vlaneseq }
  0xa2   :  { %1399 = vmatprep.subr.bf16.mxu1 %v2502_v2  ;;  %v2582_v2 = vld [vmem:[#allocation4 + $0x98] sm:$0xff]  }
  0xa4   :  { %1177 = vmatpush1.bf16.msra.mxu0 %v2497_v3  ;;  %v87_v3 = vshrl.u32 %v86_v1, 7 }
  0xa5   :  { %1400 = vmatpush1.bf16.msra.mxu1 %v2500_v4  ;;  %1178 = vmatprep.subr.bf16.mxu0 %v2505_v5  ;;  %v2583_v4 = vld [vmem:[#allocation4 + $0xa0] sm:$0xff]  }
  0xa6   :  { %1401 = vmatprep.subr.bf16.mxu1 %v2508_v6  ;;  %v2822_v5 = vsub.s32 0, %v87_v3  ;;  %v84_v6 = vld [vmem:[%s2921_s2] sm:$0x3] }
  0xa8   :  { %1179 = vmatpush1.bf16.msra.mxu0 %v2503_v7  ;;  %v2827_v7 = vsub.s32 1, %v87_v3 }
  0xa9   :  { %1402 = vmatpush1.bf16.msra.mxu1 %v2506_v8  ;;  %1180 = vmatprep.subr.bf16.mxu0 %v2511_v9  ;;  %v2584_v8 = vld [vmem:[#allocation4 + $0xa8] sm:$0xff]   ;;  %v89_v9 = vrot.slane %v84_v6, %v2822_v5 }
  0xaa   :  { %1403 = vmatprep.subr.bf16.mxu1 %v2514_v10  ;;  %v93_v10 = vrot.slane %v84_v6, %v2827_v7 }
  0xac   :  { %1181 = vmatpush1.bf16.msra.mxu0 %v2509_v43  ;;  %v2585_v43 = vld [vmem:[#allocation4 + $0xb0] sm:$0xff]  }
  0xad   :  { %1404 = vmatpush1.bf16.msra.mxu1 %v2512_v11  ;;  %1182 = vmatprep.subr.bf16.mxu0 %v2517_v12 }
  0xae   :  { %1405 = vmatprep.subr.bf16.mxu1 %v2520_v13 }
  0xb0   :  { %1183 = vmatpush1.bf16.msra.mxu0 %v2515_v14 }
  0xb1   :  { %1406 = vmatpush1.bf16.msra.mxu1 %v2518_v15  ;;  %1184 = vmatprep.subr.bf16.mxu0 %v2523_v16 }
  0xb2   :  { %1407 = vmatprep.subr.bf16.mxu1 %v2526_v17 }
  0xb4   :  { %1185 = vmatpush1.bf16.msra.mxu0 %v2521_v18 }
  0xb5   :  { %1408 = vmatpush1.bf16.msra.mxu1 %v2524_v19  ;;  %1186 = vmatprep.subr.bf16.mxu0 %v2529_v20 }
  0xb6   :  { %1409 = vmatprep.subr.bf16.mxu1 %v2532_v21 }
  0xb8   :  { %1187 = vmatpush1.bf16.msra.mxu0 %v2527_v22  ;;  %v2586_v22 = vld [vmem:[#allocation4 + $0xb8] sm:$0xff]  }
  0xb9   :  { %1410 = vmatpush1.bf16.msra.mxu1 %v2530_v23  ;;  %1188 = vmatprep.subr.bf16.mxu0 %v2535_v24  ;;  %v2048_v24 = vld [vmem:[%s2921_s2 + $0x2] sm:$0x3] }
  0xba   :  { %1411 = vmatprep.subr.bf16.mxu1 %v2538_v25  ;;  %v2587_v25 = vld [vmem:[#allocation4 + $0xc0] sm:$0xff]  }
  0xbc   :  { %1189 = vmatpush1.bf16.msra.mxu0 %v2533_v26  ;;  %v322_v26 = vrot.slane %v2048_v24, %v2822_v5 }
  0xbd   :  { %1412 = vmatpush1.bf16.msra.mxu1 %v2536_v27  ;;  %1190 = vmatprep.subr.bf16.mxu0 %v2541_v28  ;;  %v326_v27 = vrot.slane %v2048_v24, %v2827_v7  ;;  %v2588_v28 = vld [vmem:[#allocation4 + $0xc8] sm:$0xff]  }
  0xbe   :  { %1413 = vmatprep.subr.bf16.mxu1 %v2544_v29 }
  0xc0   :  { %1191 = vmatpush1.bf16.msra.mxu0 %v2539_v30 }
  0xc1   :  { %1414 = vmatpush1.bf16.msra.mxu1 %v2542_v31  ;;  %1192 = vmatprep.subr.bf16.mxu0 %v2547_v32  ;;  %v2589_v31 = vld [vmem:[#allocation4 + $0xd0] sm:$0xff]  }
  0xc2   :  { %1415 = vmatprep.subr.bf16.mxu1 %v2550_v33 }
  0xc4   :  { %1193 = vmatpush1.bf16.msra.mxu0 %v2545_v34 }
  0xc5   :  { %1416 = vmatpush1.bf16.msra.mxu1 %v2548_v35  ;;  %1194 = vmatprep.subr.bf16.mxu0 %v2553_v36  ;;  %v2590_v36 = vld [vmem:[#allocation4 + $0xd8] sm:$0xff]  }
  0xc6   :  { %1417 = vmatprep.subr.bf16.mxu1 %v2556_v37 }
  0xc8   :  { %1195 = vmatpush1.bf16.msra.mxu0 %v2551_v38 }
  0xc9   :  { %1418 = vmatpush1.bf16.msra.mxu1 %v2554_v39  ;;  %1196 = vmatprep.subr.bf16.mxu0 %v2559_v40 }
  0xca   :  { %1419 = vmatprep.subr.bf16.mxu1 %v2562_v41 }
  0xcc   :  { %1197 = vmatpush1.bf16.msra.mxu0 %v2557_v42 }
  0xcd   :  { %1420 = vmatpush1.bf16.msra.mxu1 %v2560_v44  ;;  %1631 = vmatprep.subr.bf16.mxu0 %v2709_v46  ;;  %v2078_v44 = vld [vmem:[%s2921_s2 + $0x4] sm:$0x3] }
  0xce   :  { %1758 = vmatprep.subr.bf16.mxu1 %v2709_v46 }
  0xcf   :  { %1203 = vmatmul.mubr.bf16.vlgmr.msra.gmra.mrb[8].mxu0 %v2785_v60 }
  0xd0   :  { %1426 = vmatmul.mubr.bf16.vlgmr.msra.gmra.mrb[8].mxu1 %v2785_v60  ;;  %v2567_v60 = vld [vmem:[#allocation4 + $0x20] sm:$0xff]   ;;  %1632 = vmatpush1.bf16.msra.mxu0 %v2577_v59 }
  0xd1   :  { %1759 = vmatpush1.bf16.msra.mxu1 %v2563_v45  ;;  %1633 = vmatprep.subr.bf16.mxu0 %v2709_v46  ;;  %v545_v45 = vrot.slane %v2078_v44, %v2822_v5 }
  0xd2   :  { %1760 = vmatprep.subr.bf16.mxu1 %v2709_v46 }
  0xd4   :  { %1634 = vmatpush1.bf16.msra.mxu0 %v2578_v61 }
  0xd5   :  { %1761 = vmatpush1.bf16.msra.mxu1 %v2564_v47  ;;  %1635 = vmatprep.subr.bf16.mxu0 %v2709_v46  ;;  %v549_v47 = vrot.slane %v2078_v44, %v2827_v7 }
  0xd6   :  { %1762 = vmatprep.subr.bf16.mxu1 %v2709_v46 }
  0xd8   :  { %1636 = vmatpush1.bf16.msra.mxu0 %v2579_v62 }
  0xd9   :  { %1763 = vmatpush1.bf16.msra.mxu1 %v2565_v48  ;;  %1637 = vmatprep.subr.bf16.mxu0 %v2709_v46 }
  0xda   :  { %1764 = vmatprep.subr.bf16.mxu1 %v2709_v46 }
  0xdc   :  { %1638 = vmatpush1.bf16.msra.mxu0 %v2580_v63  ;;  %v2112_v63 = vld [vmem:[%s2921_s2 + $0x6] sm:$0x3] }
  0xdd   :  { %1765 = vmatpush1.bf16.msra.mxu1 %v2566_v49  ;;  %1639 = vmatprep.subr.bf16.mxu0 %v2709_v46 }
  0xde   :  { %1766 = vmatprep.subr.bf16.mxu1 %v2709_v46 }
  0xe0   :  { %1640 = vmatpush1.bf16.msra.mxu0 %v2581_v0 }
  0xe1   :  { %1767 = vmatpush1.bf16.msra.mxu1 %v2567_v60  ;;  %1641 = vmatprep.subr.bf16.mxu0 %v2709_v46 }
  0xe2   :  { %1768 = vmatprep.subr.bf16.mxu1 %v2709_v46 }
  0xe4   :  { %1642 = vmatpush1.bf16.msra.mxu0 %v2582_v2  ;;  %v800_v2 = vrot.slane %v2112_v63, %v2822_v5 }
  0xe5   :  { %1769 = vmatpush1.bf16.msra.mxu1 %v2568_v50  ;;  %1643 = vmatprep.subr.bf16.mxu0 %v2709_v46 }
  0xe6   :  { %1770 = vmatprep.subr.bf16.mxu1 %v2709_v46 }
  0xe8   :  { %1644 = vmatpush1.bf16.msra.mxu0 %v2583_v4  ;;  %v804_v4 = vrot.slane %v2112_v63, %v2827_v7 }
  0xe9   :  { %1771 = vmatpush1.bf16.msra.mxu1 %v2569_v51  ;;  %1645 = vmatprep.subr.bf16.mxu0 %v2709_v46 }
  0xea   :  { %1772 = vmatprep.subr.bf16.mxu1 %v2709_v46 }
  0xec   :  { %1646 = vmatpush1.bf16.msra.mxu0 %v2584_v8 }
  0xed   :  { %1773 = vmatpush1.bf16.msra.mxu1 %v2570_v52  ;;  %1647 = vmatprep.subr.bf16.mxu0 %v2709_v46 }
  0xee   :  { %1774 = vmatprep.subr.bf16.mxu1 %v2709_v46 }
  0xf0   :  { %1648 = vmatpush1.bf16.msra.mxu0 %v2585_v43 }
  0xf1   :  { %1775 = vmatpush1.bf16.msra.mxu1 %v2571_v53  ;;  %1649 = vmatprep.subr.bf16.mxu0 %v2709_v46 }
  0xf2   :  { %1776 = vmatprep.subr.bf16.mxu1 %v2709_v46 }
  0xf4   :  { %1650 = vmatpush1.bf16.msra.mxu0 %v2586_v22 }
  0xf5   :  { %1777 = vmatpush1.bf16.msra.mxu1 %v2572_v54  ;;  %1651 = vmatprep.subr.bf16.mxu0 %v2709_v46 }
  0xf6   :  { %1778 = vmatprep.subr.bf16.mxu1 %v2709_v46 }
  0xf8   :  { %1652 = vmatpush1.bf16.msra.mxu0 %v2587_v25 }
  0xf9   :  { %1779 = vmatpush1.bf16.msra.mxu1 %v2573_v55  ;;  %1653 = vmatprep.subr.bf16.mxu0 %v2709_v46 }
  0xfa   :  { %1780 = vmatprep.subr.bf16.mxu1 %v2709_v46 }
  0xfc   :  { %1654 = vmatpush1.bf16.msra.mxu0 %v2588_v28 }
  0xfd   :  { %1781 = vmatpush1.bf16.msra.mxu1 %v2574_v56  ;;  %1655 = vmatprep.subr.bf16.mxu0 %v2709_v46 }
  0xfe   :  { %1782 = vmatprep.subr.bf16.mxu1 %v2709_v46 }
 0x100   :  { %1656 = vmatpush1.bf16.msra.mxu0 %v2589_v31 }
 0x101   :  { %1783 = vmatpush1.bf16.msra.mxu1 %v2575_v57  ;;  %1657 = vmatprep.subr.bf16.mxu0 %v2709_v46 }
 0x102   :  { %1784 = vmatprep.subr.bf16.mxu1 %v2709_v46 }
 0x104   :  { %1658 = vmatpush1.bf16.msra.mxu0 %v2590_v36 }
 0x105   :  { %1785 = vmatpush1.bf16.msra.mxu1 %v2576_v58 }
 0x132   :  { %v280_v11 = vpop.f32.mrb[0].mxu0 }
 0x133   :  { %v503_v12 = vpop.f32.mrb[0].mxu1  ;;  %v281_v13 = vadd.f32 %v280_v11, %v89_v9  ;;  %v282_v14 = vpop.f32.mrb[1].mxu0 }
 0x134   :  { %v505_v15 = vpop.f32.mrb[1].mxu1  ;;  %v283_v16 = vadd.f32 %v282_v14, %v93_v10  ;;  %v284_v17 = vpop.f32.mrb[2].mxu0  ;;  %v504_v29 = vadd.f32 %v503_v12, %v322_v26 }
 0x135   :  { %v507_v18 = vpop.f32.mrb[2].mxu1  ;;  %v2108_v19 = vmul.f32 -1.442695, %v281_v13  ;;  %v285_v20 = vpop.f32.mrb[3].mxu0  ;;  %v506_v30 = vadd.f32 %v505_v15, %v326_v27 }
 0x136   :  { %v508_v21 = vpop.f32.mrb[3].mxu1  ;;  %v2109_v23 = vmul.f32 -1.442695, %v283_v16  ;;  %v2142_v20 = vld [vmem:[%s2921_s2 + $0x8] sm:$0x3] }
 0x137   :  { %2603 = vpow2.f32 %v2108_v19  ;;  %v2172_v21 = vld [vmem:[%s2921_s2 + $0xa] sm:$0x3]  ;;  %v1023_v24 = vrot.slane %v2142_v20, %v2822_v5  ;;  %v1027_v27 = vrot.slane %v2142_v20, %v2827_v7 }
 0x138   :  { %2605 = vpow2.f32 %v2109_v23  ;;  %v1246_v25 = vrot.slane %v2172_v21, %v2822_v5  ;;  %v1250_v28 = vrot.slane %v2172_v21, %v2827_v7 }
 0x139   :  { %2607 = vtanh.f32 %v504_v29 }
 0x13a   :  { %2609 = vtanh.f32 %v506_v30 }
 0x141   :  { %v2604_v32 = vpop.eup %2603 }
 0x142   :  { %v2606_v33 = vpop.eup %2605  ;;  %v739_v34 = vadd.f32 1.0, %v2604_v32 }
 0x143   :  { %v740_v35 = vadd.f32 1.0, %v2606_v33  ;;  %v2608_v37 = vpop.eup %2607 }
 0x144   :  { %2611 = vrcp.f32 %v739_v34  ;;  %v2610_v38 = vpop.eup %2609 }
 0x145   :  { %2613 = vrcp.f32 %v740_v35 }
 0x14e   :  { %v2612_v39 = vpop.eup %2611 }
 0x14f   :  { %v2614_v40 = vpop.eup %2613  ;;  %v747_v41 = vmul.f32 %v2612_v39, %v2608_v37 }
 0x150   :  { %v748_v42 = vmul.f32 %v2614_v40, %v2610_v38 }
 0x16a   :  { %v726_v48 = vpop.f32.mrb[4].mxu0 }
 0x16b   :  { %v981_v49 = vpop.f32.mrb[4].mxu1  ;;  %v727_v60 = vadd.f32 %v726_v48, %v545_v45  ;;  %v728_v46 = vpop.f32.mrb[5].mxu0 }
 0x16c   :  { %v983_v50 = vpop.f32.mrb[5].mxu1  ;;  %v729_v51 = vadd.f32 %v728_v46, %v549_v47  ;;  %v730_v52 = vpop.f32.mrb[6].mxu0  ;;  %v982_v43 = vadd.f32 %v981_v49, %v800_v2  ;;  %v2592_v2 = vld [vmem:[%s2923_s4 + $0x8] sm:$0xff]  }
 0x16d   :  { %v985_v53 = vpop.f32.mrb[6].mxu1  ;;  %v2110_v54 = vmul.f32 -1.442695, %v727_v60  ;;  %v731_v55 = vpop.f32.mrb[7].mxu0  ;;  %v984_v11 = vadd.f32 %v983_v50, %v804_v4  ;;  %v2594_v4 = vld [vmem:[%s2923_s4 + $0x18] sm:$0xff]  }
 0x16e   :  { %v986_v56 = vpop.f32.mrb[7].mxu1  ;;  %v2111_v57 = vmul.f32 -1.442695, %v729_v51  ;;  %v2202_v15 = vmul.f32 -1.442695, %v982_v43 }
 0x16f   :  { %2615 = vpow2.f32 %v2110_v54  ;;  %v2203_v17 = vmul.f32 -1.442695, %v984_v11 }
 0x170   :  { %2617 = vpow2.f32 %v2111_v57 }
 0x171   :  { %2619 = vtanh.f32 %v747_v41 }
 0x179   :  { %v2616_v58 = vpop.eup %2615 }
 0x17a   :  { %v755_v59 = vadd.f32 1.0, %v2616_v58  ;;  %v2618_v61 = vpop.eup %2617 }
 0x17b   :  { %v756_v62 = vadd.f32 1.0, %v2618_v61  ;;  %v2620_v0 = vpop.eup %2619 }
 0x17c   :  { %2621 = vrcp.f32 %v755_v59 }
 0x17d   :  { %2623 = vtanh.f32 %v748_v42 }
 0x17e   :  { %2625 = vrcp.f32 %v756_v62 }
 0x17f   :  { %2627 = vpow2.f32 %v2202_v15 }
 0x180   :  { %2629 = vpow2.f32 %v2203_v17 }
 0x186   :  { %v2622_v1 = vpop.eup %2621 }
 0x187   :  { %v2624_v3 = vpop.eup %2623  ;;  %v763_v6 = vmul.f32 %v2622_v1, %v2620_v0  ;;  %v2591_v0 = vld [vmem:[%s2923_s4] sm:$0xff]   ;;  %v2710_v1 = vmov 0.0  }
 0x188   :  { %v2626_v8 = vpop.eup %2625  ;;  %2268 = vmatprep.subr.bf16.mxu0 %v2710_v1  ;;  %2288 = vmatprep.subr.bf16.mxu1 %v2710_v1 }
 0x189   :  { %v764_v9 = vmul.f32 %v2626_v8, %v2624_v3  ;;  %vm1466_vm1 = vcmp.gt.f32.partialorder %v763_v6, 0.0  ;;  %v1468_v10 = vmul.f32 0.2, %v763_v6  ;;  %v2628_v19 = vpop.eup %2627  ;;  %v2593_v3 = vld [vmem:[%s2923_s4 + $0x10] sm:$0xff]   ;;  %v2596_v8 = vld [vmem:[%s2923_s4 + $0x28] sm:$0xff]  }
 0x18a   :  { %v2630_v22 = vpop.eup %2629  ;;  %v1440_v23 = vadd.f32 1.0, %v2628_v19 }
 0x18b   :  { %vm1467_vm2 = vcmp.gt.f32.partialorder %v764_v9, 0.0  ;;  %v1469_v12 = vmul.f32 0.2, %v764_v9  ;;  %v1470_v13 = vsel %vm1466_vm1, %v763_v6, %v1468_v10  ;;  %v1441_v26 = vadd.f32 1.0, %v2630_v22  ;;  %v2595_v6 = vld [vmem:[%s2923_s4 + $0x20] sm:$0xff]   ;;  %v2598_v10 = vld [vmem:[%s2923_s4 + $0x38] sm:$0xff]  }
 0x18c   :  { %v1472_v18 = vpack.c.bf16 %v1470_v13, %v1470_v13  ;;  %2631 = vrcp.f32 %v1440_v23  ;;  %v2599_v22 = vld [vmem:[%s2924_s5] sm:$0xff]   ;;  %v2600_v23 = vld [vmem:[%s2924_s5 + $0x8] sm:$0xff]  }
 0x18d   :  { %v1471_v14 = vsel %vm1467_vm2, %v764_v9, %v1469_v12  ;;  %2633 = vrcp.f32 %v1441_v26  ;;  %v2597_v9 = vld [vmem:[%s2923_s4 + $0x30] sm:$0xff]   ;;  %v2237_v26 = vld [vmem:[%s2925_s6 + $0x1] ss:$0 sm:$0xff] }
 0x18e   :  { %v1473_v16 = vpack.c.bf16 %v1471_v14, %v1471_v14  ;;  %v2236_v14 = vld [vmem:[%s2925_s6] ss:$0 sm:$0xff] }
 0x190   :  { %2235 = vmatprep.mubr.msk.bf16.mxu1 %vm242_vm0, %v1473_v16 }
 0x191   :  { %1791 = vmatmul.mubr.bf16.vlgmr.msra.gmra.mrb[12].mxu1 %v1472_v18 }
 0x192   :  { %2296 = vmatprep.mubr.msk.bf16.mxu1 %vm2711_vm5, %v2710_v1  ;;  %2289 = vmatpush3.bf16.msra.mxu1 %v2599_v22 }
 0x193   :  { %2290 = vmatprep.subr.bf16.mxu1 %v2710_v1 }
 0x196   :  { %v2632_v7 = vpop.eup %2631  ;;  %2291 = vmatpush3.bf16.msra.mxu1 %v2600_v23 }
 0x197   :  { %v2634_v42 = vpop.eup %2633  ;;  %2292 = vmatprep.subr.bf16.mxu1 %v2710_v1 }
 0x1a2   :  { %v1204_v29 = vpop.f32.mrb[8].mxu0 }
 0x1a3   :  { %v1427_v30 = vpop.f32.mrb[8].mxu1  ;;  %v1205_v31 = vadd.f32 %v1204_v29, %v1023_v24  ;;  %v1206_v33 = vpop.f32.mrb[9].mxu0  ;;  %v2601_v24 = vld [vmem:[%s2924_s5 + $0x10] sm:$0xff]  }
 0x1a4   :  { %v1428_v32 = vadd.f32 %v1427_v30, %v1246_v25  ;;  %v1429_v34 = vpop.f32.mrb[9].mxu1  ;;  %v1207_v35 = vadd.f32 %v1206_v33, %v1027_v27  ;;  %v1208_v37 = vpop.f32.mrb[10].mxu0  ;;  %2293 = vmatpush3.bf16.msra.mxu1 %v2601_v24  ;;  %v2602_v25 = vld [vmem:[%s2924_s5 + $0x18] sm:$0xff]  }
 0x1a5   :  { %v1430_v36 = vadd.f32 %v1429_v34, %v1250_v28  ;;  %v1431_v38 = vpop.f32.mrb[10].mxu1  ;;  %2635 = vtanh.f32 %v1205_v31  ;;  %v1209_v5 = vpop.f32.mrb[11].mxu0  ;;  %2294 = vmatprep.subr.bf16.mxu1 %v2710_v1  ;;  %v2246_v34 = vld [vmem:[%s2925_s6 + $0x2] ss:$0 sm:$0xff] }
 0x1a6   :  { %v2204_v39 = vmul.f32 -1.442695, %v1428_v32  ;;  %v1432_v40 = vpop.f32.mrb[11].mxu1  ;;  %2637 = vtanh.f32 %v1207_v35  ;;  %v2252_v5 = vld [vmem:[%s2925_s6 + $0x4] ss:$0 sm:$0xff] }
 0x1a7   :  { %v2205_v41 = vmul.f32 -1.442695, %v1430_v36 }
 0x1a8   :  { %2639 = vpow2.f32 %v2204_v39  ;;  %2295 = vmatpush3.bf16.msra.mxu1 %v2602_v25 }
 0x1a9   :  { %2641 = vpow2.f32 %v2205_v41 }
 0x1af   :  { %v2636_v44 = vpop.eup %2635 }
 0x1b0   :  { %v2638_v45 = vpop.eup %2637  ;;  %v1448_v47 = vmul.f32 %v2636_v44, %v2632_v7 }
 0x1b1   :  { %v1449_v49 = vmul.f32 %v2638_v45, %v2634_v42  ;;  %v2253_v42 = vld [vmem:[%s2925_s6 + $0x3] ss:$0 sm:$0xff] }
 0x1b2   :  { %v2640_v48 = vpop.eup %2639  ;;  %2643 = vtanh.f32 %v1448_v47 }
 0x1b3   :  { %v2642_v60 = vpop.eup %2641  ;;  %v1456_v46 = vadd.f32 1.0, %v2640_v48  ;;  %2645 = vtanh.f32 %v1449_v49 }
 0x1b4   :  { %v1457_v50 = vadd.f32 1.0, %v2642_v60 }
 0x1b5   :  { %2647 = vrcp.f32 %v1456_v46 }
 0x1b6   :  { %2649 = vrcp.f32 %v1457_v50 }
 0x1bc   :  { %v2644_v51 = vpop.eup %2643 }
 0x1bd   :  { %v2646_v52 = vpop.eup %2645 }
 0x1bf   :  { %v2648_v53 = vpop.eup %2647 }
 0x1c0   :  { %v2650_v54 = vpop.eup %2649  ;;  %v1464_v55 = vmul.f32 %v2648_v53, %v2644_v51 }
 0x1c1   :  { %v1465_v56 = vmul.f32 %v2650_v54, %v2646_v52 }
 0x1c2   :  { %vm1474_vm3 = vcmp.gt.f32.partialorder %v1464_v55, 0.0  ;;  %v1476_v57 = vmul.f32 0.2, %v1464_v55 }
 0x1c3   :  { %vm1475_vm4 = vcmp.gt.f32.partialorder %v1465_v56, 0.0  ;;  %v1477_v58 = vmul.f32 0.2, %v1465_v56 }
 0x1c4   :  { %v1478_v59 = vsel %vm1474_vm3, %v1464_v55, %v1476_v57 }
 0x1c5   :  { %v1479_v61 = vsel %vm1475_vm4, %v1465_v56, %v1477_v58  ;;  %v1480_v63 = vpack.c.bf16 %v1478_v59, %v1478_v59 }
 0x1c6   :  { %v1481_v62 = vpack.c.bf16 %v1479_v61, %v1479_v61 }
 0x1c8   :  { %2220 = vmatprep.mubr.msk.bf16.mxu0 %vm242_vm0, %v1481_v62 }
 0x1c9   :  { %1664 = vmatmul.mubr.bf16.vlgmr.msra.gmra.mrb[12].mxu0 %v1480_v63 }
 0x1ca   :  { %2269 = vmatpush3.bf16.msra.mxu0 %v2591_v0  ;;  %2284 = vmatprep.mubr.msk.bf16.mxu0 %vm2711_vm5, %v2710_v1 }
 0x1cb   :  { %2270 = vmatprep.subr.bf16.mxu0 %v2710_v1 }
 0x1ce   :  { %2271 = vmatpush3.bf16.msra.mxu0 %v2592_v2 }
 0x1cf   :  { %2272 = vmatprep.subr.bf16.mxu0 %v2710_v1 }
 0x1d2   :  { %2273 = vmatpush3.bf16.msra.mxu0 %v2593_v3 }
 0x1d3   :  { %2274 = vmatprep.subr.bf16.mxu0 %v2710_v1 }
 0x1d6   :  { %2275 = vmatpush3.bf16.msra.mxu0 %v2594_v4 }
 0x1d7   :  { %2276 = vmatprep.subr.bf16.mxu0 %v2710_v1 }
 0x1da   :  { %2277 = vmatpush3.bf16.msra.mxu0 %v2595_v6 }
 0x1db   :  { %2278 = vmatprep.subr.bf16.mxu0 %v2710_v1 }
 0x1de   :  { %2279 = vmatpush3.bf16.msra.mxu0 %v2596_v8 }
 0x1df   :  { %2280 = vmatprep.subr.bf16.mxu0 %v2710_v1 }
 0x1e2   :  { %2281 = vmatpush3.bf16.msra.mxu0 %v2597_v9 }
 0x1e3   :  { %2282 = vmatprep.subr.bf16.mxu0 %v2710_v1 }
 0x1e6   :  { %2283 = vmatpush3.bf16.msra.mxu0 %v2598_v10 }
 0x264   :  { %v1792_v43 = vpop.f32.mrb[12].mxu1 }
 0x265   :  { %v1794_v11 = vpop.f32.mrb[13].mxu1 }
 0x266   :  { %v1795_v12 = vpop.f32.mrb[14].mxu1 }
 0x267   :  { %v1796_v13 = vpop.f32.mrb[15].mxu1 }
 0x29c   :  { %v1665_v15 = vpop.f32.mrb[12].mxu0 }
 0x29d   :  { %v1793_v16 = vadd.f32 %v1792_v43, %v1665_v15  ;;  %v1667_v17 = vpop.f32.mrb[13].mxu0 }
 0x29e   :  { %v1668_v18 = vpop.f32.mrb[14].mxu0 }
 0x29f   :  { %v1802_v19 = vadd.f32 %v2236_v14, %v1793_v16  ;;  %v1669_v20 = vpop.f32.mrb[15].mxu0 }
 0x2a1   :  { %v1803_v21 = vpack.c.bf16 %v1802_v19, %v1802_v19 }
 0x2a3   :  { %2285 = vmatmul.mubr.bf16.vlgmr.msra.gmra.mrb[16].mxu0 %v1803_v21 }
 0x376   :  { %v1906_v27 = vpop.f32.mrb[16].mxu0 }
 0x377   :  { %v1907_v28 = vadd.f32 %v2237_v26, %v1906_v27  ;;  %v2286_v29 = vpop.f32.mrb[17].mxu0 }
 0x378   :  { %v1909_v30 = vpop.f32.mrb[18].mxu0 }
 0x379   :  { %2651 = vtanh.f32 %v1907_v28  ;;  %v2287_v31 = vpop.f32.mrb[19].mxu0 }
 0x383   :  { %v2652_v32 = vpop.eup %2651 }
 0x384   :  { %v1913_v33 = vpack.c.bf16 %v2652_v32, %v2652_v32 }
 0x386   :  { %2297 = vmatmul.mubr.msk.bf16.vlgmr.msra.gmra.mrb[16].mxu1 %vm1950_vm6, %v1913_v33 }
 0x459   :  { %v1988_v35 = vpop.f32.mrb[16].mxu1 }
 0x45a   :  { %v1989_v36 = vadd.f32 %v2246_v34, %v1988_v35  ;;  %v2298_v37 = vpop.f32.mrb[17].mxu1 }
 0x45b   :  { %v1991_v38 = vpop.f32.mrb[18].mxu1 }
 0x45c   :  { %2653 = vtanh.f32 %v1989_v36  ;;  %v2299_v39 = vpop.f32.mrb[19].mxu1 }
 0x466   :  { %v2654_v40 = vpop.eup %2653 }
 0x467   :  { %v1999_v41 = vmul.f32 %v2654_v40, %v2252_v5 }
 0x469   :  { %v2001_v7 = vsel %vm2000_vm7, %v1999_v41, 0.0 }
 0x46a   :  { %2002 = vadd.xlane.f32.xlu0 %v2001_v7 }
 0x4f7   :  { %v2003_v44 = vpop.xlane.xlu0 %2002 }
 0x4f8   :  { %v2008_v45 = vadd.f32 %v2253_v42, %v2003_v44 }
 0x4fa   :  { %2010 = vst.msk [vmem:[%s2926_s7] sm:$0xff] %vm2009_vm8, %v2008_v45 }
 0x4fb   :  { %2015 = vsyncpa [#allocation3], 1 }
 0x4fc   :  { %2016 = vsyncpa [#allocation5], 1 }

</bundles_post_ra>
